<compile_context>
chip_gen: v6e
topology: v6e:2x2x1
jax: 0.10.0
libtpu: 0.0.40
codegen_flags: <defaults>
</compile_context>

<pallas_src>
import functools

import numpy as np
import jax
import jax.numpy as jnp
from jax.experimental import pallas as pl
from jax.experimental.pallas import tpu as pltpu


def _attend(q, k, v, wo, bo):
    """Head-batched attention + fused output projection.

    q: (Lq, H, Dh) already scaled by 1/sqrt(Dh); k, v: (Lk, H, Dh);
    wo: (E, E) (torch out_proj weight, pre-transposed); bo: (1, E).
    Returns (Lq, E) in float32.
    """
    s = jnp.einsum("qhd,khd->hqk", q, k, preferred_element_type=jnp.float32)
    s = s - jnp.max(s, axis=-1, keepdims=True)
    p = jnp.exp(s)
    p = p / jnp.sum(p, axis=-1, keepdims=True)          # exact divide (bit-close)
    ctx = jnp.einsum("hqk,khd->qhd", p, v, preferred_element_type=jnp.float32)
    lq = ctx.shape[0]
    ctx2 = ctx.reshape(lq, -1)                          # (Lq, H*Dh = E): heads back in lanes
    return jnp.dot(ctx2, wo, preferred_element_type=jnp.float32) + bo


def _co_attention_kernel(text_ref, image_ref,
                         w_t_ref, b_t_ref, w_i_ref, b_i_ref,
                         wo_t_ref, bo_t_ref, wo_i_ref, bo_i_ref,
                         t2i_ref, i2t_ref,
                         *, num_heads, embed_dim):
    H, E = num_heads, embed_dim
    Dh = E // H
    Lt = text_ref.shape[1]
    Li = image_ref.shape[1]

    x_t = text_ref[0]   # (Lt, E) -- this grid step's batch element
    x_i = image_ref[0]  # (Li, E)

    # One lane-dense (E, 3E) projection matmul per source.  Column blocks:
    #   [0:E)   Q for this source's own attention direction (pre-scaled)
    #   [E:2E)  K consumed by the other direction
    #   [2E:3E) V consumed by the other direction
    p_t = jnp.dot(x_t, w_t_ref[...], preferred_element_type=jnp.float32) + b_t_ref[...]
    p_i = jnp.dot(x_i, w_i_ref[...], preferred_element_type=jnp.float32) + b_i_ref[...]

    q_t = p_t[:, 0 * E:1 * E].reshape(Lt, H, Dh)
    k_t = p_t[:, 1 * E:2 * E].reshape(Lt, H, Dh)
    v_t = p_t[:, 2 * E:3 * E].reshape(Lt, H, Dh)
    q_i = p_i[:, 0 * E:1 * E].reshape(Li, H, Dh)
    k_i = p_i[:, 1 * E:2 * E].reshape(Li, H, Dh)
    v_i = p_i[:, 2 * E:3 * E].reshape(Li, H, Dh)

    # text attends image (text_att), image attends text (image_att).
    t2i_ref[0] = _attend(q_t, k_i, v_i, wo_t_ref[...], bo_t_ref[...]).astype(t2i_ref.dtype)
    i2t_ref[0] = _attend(q_i, k_t, v_t, wo_i_ref[...], bo_i_ref[...]).astype(i2t_ref.dtype)


def _split_in_proj(params, embed_dim):
    E = embed_dim
    w = params["in_proj_weight"]   # (3E, E), torch convention y = x @ w.T + b
    b = params["in_proj_bias"]     # (3E,)
    return w[:E], w[E:2 * E], w[2 * E:], b[:E], b[E:2 * E], b[2 * E:]


def co_attention(text, image, text_params, image_params, num_heads=8):
    """CoAttention.forward: returns (text_to_image, image_to_text); (L, N, E) layout."""
    Lt, B, E = text.shape
    Li = image.shape[0]
    assert E % num_heads == 0
    Dh = E // num_heads
    scale = 1.0 / float(np.sqrt(Dh))

    wq_t, wk_t, wv_t, bq_t, bk_t, bv_t = _split_in_proj(text_params, E)
    wq_i, wk_i, wv_i, bq_i, bk_i, bv_i = _split_in_proj(image_params, E)

    # Per-source fused, lane-dense (E, 3E) projections (torch Linear: y = x @ W.T);
    # 1/sqrt(Dh) folded into the Q block (mathematically identical to scaling q).
    w_text = jnp.concatenate([wq_t.T * scale, wk_i.T, wv_i.T], axis=1)    # (E, 3E)
    b_text = jnp.concatenate([bq_t * scale, bk_i, bv_i]).reshape(1, 3 * E)
    w_img = jnp.concatenate([wq_i.T * scale, wk_t.T, wv_t.T], axis=1)     # (E, 3E)
    b_img = jnp.concatenate([bq_i * scale, bk_t, bv_t]).reshape(1, 3 * E)

    # Out-projections as plain (E, E) matrices (pre-transposed for x @ W).
    wo_text = text_params["out_proj_weight"].T
    bo_text = text_params["out_proj_bias"].reshape(1, E)
    wo_img = image_params["out_proj_weight"].T
    bo_img = image_params["out_proj_bias"].reshape(1, E)

    # Batch-major so every grid step reads/writes a contiguous (L, E) slab.
    text_bm = jnp.transpose(text, (1, 0, 2))     # (B, Lt, E)
    image_bm = jnp.transpose(image, (1, 0, 2))   # (B, Li, E)

    kernel = functools.partial(_co_attention_kernel,
                               num_heads=num_heads, embed_dim=E)

    def per_batch(shape):
        return pl.BlockSpec(shape, lambda b: (b,) + (0,) * (len(shape) - 1))

    def resident(shape):
        return pl.BlockSpec(shape, lambda b: (0,) * len(shape))

    # TODO(synk): at production shapes, cast matmul operands to bfloat16 (keep
    # f32 accumulation + f32 softmax) and add a query-tile grid axis so the
    # working set fits v7x's 64 MiB / v5e's 16 MiB-scoped VMEM.
    t2i_bm, i2t_bm = pl.pallas_call(
        kernel,
        out_shape=(jax.ShapeDtypeStruct((B, Lt, E), text.dtype),
                   jax.ShapeDtypeStruct((B, Li, E), image.dtype)),
        grid=(B,),
        in_specs=[
            per_batch((1, Lt, E)), per_batch((1, Li, E)),
            resident((E, 3 * E)), resident((1, 3 * E)),
            resident((E, 3 * E)), resident((1, 3 * E)),
            resident((E, E)), resident((1, E)),
            resident((E, E)), resident((1, E)),
        ],
        out_specs=(per_batch((1, Lt, E)), per_batch((1, Li, E))),
        compiler_params=pltpu.CompilerParams(
            dimension_semantics=("parallel",)),
    )(text_bm, image_bm, w_text, b_text, w_img, b_img,
      wo_text, bo_text, wo_img, bo_img)

    # Back to the PyTorch (L, N, E) layout (tiny wrapper-side transposes).
    return jnp.transpose(t2i_bm, (1, 0, 2)), jnp.transpose(i2t_bm, (1, 0, 2))


# ---------------- pure-JAX reference (verification only) ----------------
def mha_ref(query, key, params, num_heads):
    Lq, B, E = query.shape
    Lk = key.shape[0]
    hd = E // num_heads
    w_in, b_in = params["in_proj_weight"], params["in_proj_bias"]
    wq, wk, wv = w_in[:E], w_in[E:2 * E], w_in[2 * E:]
    bq, bk, bv = b_in[:E], b_in[E:2 * E], b_in[2 * E:]
    q = jnp.einsum("lbe,fe->lbf", query, wq) + bq
    k = jnp.einsum("lbe,fe->lbf", key, wk) + bk
    v = jnp.einsum("lbe,fe->lbf", key, wv) + bv
    qh = q.reshape(Lq, B, num_heads, hd) * (1.0 / np.sqrt(hd))
    kh = k.reshape(Lk, B, num_heads, hd)
    vh = v.reshape(Lk, B, num_heads, hd)
    s = jnp.einsum("qbhd,kbhd->bhqk", qh, kh)
    p = jax.nn.softmax(s, axis=-1)
    ctx = jnp.einsum("bhqk,kbhd->qbhd", p, vh).reshape(Lq, B, E)
    return jnp.einsum("lbe,fe->lbf", ctx, params["out_proj_weight"]) + params["out_proj_bias"]


def init_mha_params(key, embed_dim):
    k1, k2, k3, k4 = jax.random.split(key, 4)
    return {
        "in_proj_weight": jax.random.normal(k1, (3 * embed_dim, embed_dim), jnp.float32) * 0.05,
        "in_proj_bias": jax.random.normal(k2, (3 * embed_dim,), jnp.float32) * 0.05,
        "out_proj_weight": jax.random.normal(k3, (embed_dim, embed_dim), jnp.float32) * 0.05,
        "out_proj_bias": jax.random.normal(k4, (embed_dim,), jnp.float32) * 0.05,
    }


if __name__ == "__main__":
    embed_dim, num_heads = 32, 8
    L_text, L_image, batch = 8, 16, 2

    root = jax.random.PRNGKey(0)
    kt, ki, kp1, kp2 = jax.random.split(root, 4)
    text = jax.random.normal(kt, (L_text, batch, embed_dim), jnp.float32)
    image = jax.random.normal(ki, (L_image, batch, embed_dim), jnp.float32)
    text_params = init_mha_params(kp1, embed_dim)
    image_params = init_mha_params(kp2, embed_dim)

    fwd = jax.jit(functools.partial(co_attention, num_heads=num_heads))
    t2i, i2t = fwd(text, image, text_params, image_params)
    jax.block_until_ready((t2i, i2t))

    assert t2i.shape == (L_text, batch, embed_dim)
    assert i2t.shape == (L_image, batch, embed_dim)

    t2i_ref = mha_ref(text, image, text_params, num_heads)
    i2t_ref = mha_ref(image, text, image_params, num_heads)
    np.testing.assert_allclose(np.asarray(t2i), np.asarray(t2i_ref), atol=1e-4, rtol=1e-4)
    np.testing.assert_allclose(np.asarray(i2t), np.asarray(i2t_ref), atol=1e-4, rtol=1e-4)

    print("KERNEL_OK")
</pallas_src>

<mosaic_0001>
module attributes {stable_mosaic.version = 11 : i64} {
  func.func @_co_attention_kernel(%arg0: i32, %arg1: memref<1x8x32xf32, #tpu.memory_space<vmem>>, %arg2: memref<1x16x32xf32, #tpu.memory_space<vmem>>, %arg3: memref<32x96xf32, #tpu.memory_space<vmem>>, %arg4: memref<1x96xf32, #tpu.memory_space<vmem>>, %arg5: memref<32x96xf32, #tpu.memory_space<vmem>>, %arg6: memref<1x96xf32, #tpu.memory_space<vmem>>, %arg7: memref<32x32xf32, #tpu.memory_space<vmem>>, %arg8: memref<1x32xf32, #tpu.memory_space<vmem>>, %arg9: memref<32x32xf32, #tpu.memory_space<vmem>>, %arg10: memref<1x32xf32, #tpu.memory_space<vmem>>, %arg11: memref<1x8x32xf32, #tpu.memory_space<vmem>>, %arg12: memref<1x16x32xf32, #tpu.memory_space<vmem>>) attributes {dimension_semantics = [#tpu.dimension_semantics<parallel>], iteration_bounds = array<i64: 2>, scalar_prefetch = 0 : i64, scratch_operands = 0 : i64, tpu.core_type = #tpu.core_type<tc>, window_params = [{transform_indices = @transform_0, window_bounds = array<i64: 1, 8, 32>}, {transform_indices = @transform_1, window_bounds = array<i64: 1, 16, 32>}, {pipeline_mode = #tpu.pipeline_mode<synchronous>, transform_indices = @transform_2, window_bounds = array<i64: 32, 96>}, {pipeline_mode = #tpu.pipeline_mode<synchronous>, transform_indices = @transform_3, window_bounds = array<i64: 1, 96>}, {pipeline_mode = #tpu.pipeline_mode<synchronous>, transform_indices = @transform_4, window_bounds = array<i64: 32, 96>}, {pipeline_mode = #tpu.pipeline_mode<synchronous>, transform_indices = @transform_5, window_bounds = array<i64: 1, 96>}, {pipeline_mode = #tpu.pipeline_mode<synchronous>, transform_indices = @transform_6, window_bounds = array<i64: 32, 32>}, {pipeline_mode = #tpu.pipeline_mode<synchronous>, transform_indices = @transform_7, window_bounds = array<i64: 1, 32>}, {pipeline_mode = #tpu.pipeline_mode<synchronous>, transform_indices = @transform_8, window_bounds = array<i64: 32, 32>}, {pipeline_mode = #tpu.pipeline_mode<synchronous>, transform_indices = @transform_9, window_bounds = array<i64: 1, 32>}, {transform_indices = @transform_10, window_bounds = array<i64: 1, 8, 32>}, {transform_indices = @transform_11, window_bounds = array<i64: 1, 16, 32>}]} {
    %c0 = arith.constant 0 : index
    %c0_0 = arith.constant 0 : index
    %c0_1 = arith.constant 0 : index
    %0 = vector.load %arg1[%c0, %c0_0, %c0_1] : memref<1x8x32xf32, #tpu.memory_space<vmem>>, vector<1x8x32xf32>
    %1 = vector.shape_cast %0 : vector<1x8x32xf32> to vector<8x32xf32>
    %c0_2 = arith.constant 0 : index
    %c0_3 = arith.constant 0 : index
    %c0_4 = arith.constant 0 : index
    %2 = vector.load %arg2[%c0_2, %c0_3, %c0_4] : memref<1x16x32xf32, #tpu.memory_space<vmem>>, vector<1x16x32xf32>
    %3 = vector.shape_cast %2 : vector<1x16x32xf32> to vector<16x32xf32>
    %c0_5 = arith.constant 0 : index
    %c0_6 = arith.constant 0 : index
    %4 = vector.load %arg3[%c0_5, %c0_6] : memref<32x96xf32, #tpu.memory_space<vmem>>, vector<32x96xf32>
    %cst = arith.constant dense<0.000000e+00> : vector<8x96xf32>
    %5 = tpu.matmul %1, %4, %cst {dimension_numbers = #tpu.dot_dimension_numbers<[1], [0], [0], [1], [0, 0, 1, 1], [], []>} : vector<8x32xf32>, vector<32x96xf32>, vector<8x96xf32> -> vector<8x96xf32>
    %c0_7 = arith.constant 0 : index
    %c0_8 = arith.constant 0 : index
    %6 = vector.load %arg4[%c0_7, %c0_8] : memref<1x96xf32, #tpu.memory_space<vmem>>, vector<1x96xf32>
    %7 = vector.broadcast %6 : vector<1x96xf32> to vector<8x96xf32>
    %8 = arith.addf %5, %7 : vector<8x96xf32>
    %c0_9 = arith.constant 0 : index
    %c0_10 = arith.constant 0 : index
    %9 = vector.load %arg5[%c0_9, %c0_10] : memref<32x96xf32, #tpu.memory_space<vmem>>, vector<32x96xf32>
    %cst_11 = arith.constant dense<0.000000e+00> : vector<16x96xf32>
    %10 = tpu.matmul %3, %9, %cst_11 {dimension_numbers = #tpu.dot_dimension_numbers<[1], [0], [0], [1], [0, 0, 1, 1], [], []>} : vector<16x32xf32>, vector<32x96xf32>, vector<16x96xf32> -> vector<16x96xf32>
    %c0_12 = arith.constant 0 : index
    %c0_13 = arith.constant 0 : index
    %11 = vector.load %arg6[%c0_12, %c0_13] : memref<1x96xf32, #tpu.memory_space<vmem>>, vector<1x96xf32>
    %12 = vector.broadcast %11 : vector<1x96xf32> to vector<16x96xf32>
    %13 = arith.addf %10, %12 : vector<16x96xf32>
    %14 = vector.extract_strided_slice %8 {offsets = [0, 0], sizes = [8, 32], strides = [1, 1]} : vector<8x96xf32> to vector<8x32xf32>
    %15 = vector.shape_cast %14 : vector<8x32xf32> to vector<8x8x4xf32>
    %16 = vector.extract_strided_slice %8 {offsets = [0, 32], sizes = [8, 32], strides = [1, 1]} : vector<8x96xf32> to vector<8x32xf32>
    %17 = vector.shape_cast %16 : vector<8x32xf32> to vector<8x8x4xf32>
    %18 = vector.extract_strided_slice %8 {offsets = [0, 64], sizes = [8, 32], strides = [1, 1]} : vector<8x96xf32> to vector<8x32xf32>
    %19 = vector.shape_cast %18 : vector<8x32xf32> to vector<8x8x4xf32>
    %20 = vector.extract_strided_slice %13 {offsets = [0, 0], sizes = [16, 32], strides = [1, 1]} : vector<16x96xf32> to vector<16x32xf32>
    %21 = vector.shape_cast %20 : vector<16x32xf32> to vector<16x8x4xf32>
    %22 = vector.extract_strided_slice %13 {offsets = [0, 32], sizes = [16, 32], strides = [1, 1]} : vector<16x96xf32> to vector<16x32xf32>
    %23 = vector.shape_cast %22 : vector<16x32xf32> to vector<16x8x4xf32>
    %24 = vector.extract_strided_slice %13 {offsets = [0, 64], sizes = [16, 32], strides = [1, 1]} : vector<16x96xf32> to vector<16x32xf32>
    %25 = vector.shape_cast %24 : vector<16x32xf32> to vector<16x8x4xf32>
    %c0_14 = arith.constant 0 : index
    %c0_15 = arith.constant 0 : index
    %26 = vector.load %arg7[%c0_14, %c0_15] : memref<32x32xf32, #tpu.memory_space<vmem>>, vector<32x32xf32>
    %c0_16 = arith.constant 0 : index
    %c0_17 = arith.constant 0 : index
    %27 = vector.load %arg8[%c0_16, %c0_17] : memref<1x32xf32, #tpu.memory_space<vmem>>, vector<1x32xf32>
    "tpu.trace_start"() <{level = 10 : i32, message = "qhd,khd->hqk"}> : () -> ()
    %cst_18 = arith.constant dense<0.000000e+00> : vector<8x8x16xf32>
    %28 = tpu.matmul %15, %23, %cst_18 {dimension_numbers = #tpu.dot_dimension_numbers<[2], [2], [0], [0], [0, 1, 0, 0, 1, 0], [1], [1]>} : vector<8x8x4xf32>, vector<16x8x4xf32>, vector<8x8x16xf32> -> vector<8x8x16xf32>
    "tpu.trace_stop"() : () -> ()
    %cst_19 = arith.constant dense<0xFF800000> : vector<8x8xf32>
    %29 = vector.multi_reduction <maximumf>, %28, %cst_19 [2] : vector<8x8x16xf32> to vector<8x8xf32>
    %30 = vector.shape_cast %29 : vector<8x8xf32> to vector<8x8x1xf32>
    %31 = vector.broadcast %30 : vector<8x8x1xf32> to vector<8x8x16xf32>
    %32 = arith.subf %28, %31 : vector<8x8x16xf32>
    %33 = math.exp %32 : vector<8x8x16xf32>
    %cst_20 = arith.constant dense<0.000000e+00> : vector<8x8xf32>
    %34 = vector.multi_reduction <add>, %33, %cst_20 [2] : vector<8x8x16xf32> to vector<8x8xf32>
    %35 = vector.shape_cast %34 : vector<8x8xf32> to vector<8x8x1xf32>
    %36 = vector.broadcast %35 : vector<8x8x1xf32> to vector<8x8x16xf32>
    %37 = arith.divf %33, %36 : vector<8x8x16xf32>
    "tpu.trace_start"() <{level = 10 : i32, message = "hqk,khd->qhd"}> : () -> ()
    %cst_21 = arith.constant dense<0.000000e+00> : vector<8x4x8xf32>
    %38 = tpu.matmul %25, %37, %cst_21 {dimension_numbers = #tpu.dot_dimension_numbers<[0], [2], [2], [1], [0, 1, 0, 2, 1, 1], [1], [0]>} : vector<16x8x4xf32>, vector<8x8x16xf32>, vector<8x4x8xf32> -> vector<8x4x8xf32>
    %39 = tpu.transpose %38, [2, 0, 1] : vector<8x4x8xf32> -> vector<8x8x4xf32>
    "tpu.trace_stop"() : () -> ()
    %40 = vector.shape_cast %39 : vector<8x8x4xf32> to vector<8x32xf32>
    %cst_22 = arith.constant dense<0.000000e+00> : vector<8x32xf32>
    %41 = tpu.matmul %40, %26, %cst_22 {dimension_numbers = #tpu.dot_dimension_numbers<[1], [0], [0], [1], [0, 0, 1, 1], [], []>} : vector<8x32xf32>, vector<32x32xf32>, vector<8x32xf32> -> vector<8x32xf32>
    %42 = vector.broadcast %27 : vector<1x32xf32> to vector<8x32xf32>
    %43 = arith.addf %41, %42 : vector<8x32xf32>
    %c0_23 = arith.constant 0 : index
    %c0_24 = arith.constant 0 : index
    %c0_25 = arith.constant 0 : index
    %44 = vector.load %arg11[%c0_23, %c0_24, %c0_25] : memref<1x8x32xf32, #tpu.memory_space<vmem>>, vector<1x8x32xf32>
    %45 = vector.shape_cast %44 : vector<1x8x32xf32> to vector<8x32xf32>
    %46 = vector.shape_cast %43 : vector<8x32xf32> to vector<1x8x32xf32>
    tpu.vector_store %arg11[%c0_23, %c0_24, %c0_25], %46 {strides = array<i32>} : memref<1x8x32xf32, #tpu.memory_space<vmem>>, vector<1x8x32xf32>,
    %c0_26 = arith.constant 0 : index
    %c0_27 = arith.constant 0 : index
    %47 = vector.load %arg9[%c0_26, %c0_27] : memref<32x32xf32, #tpu.memory_space<vmem>>, vector<32x32xf32>
    %c0_28 = arith.constant 0 : index
    %c0_29 = arith.constant 0 : index
    %48 = vector.load %arg10[%c0_28, %c0_29] : memref<1x32xf32, #tpu.memory_space<vmem>>, vector<1x32xf32>
    "tpu.trace_start"() <{level = 10 : i32, message = "qhd,khd->hqk"}> : () -> ()
    %cst_30 = arith.constant dense<0.000000e+00> : vector<8x16x8xf32>
    %49 = tpu.matmul %21, %17, %cst_30 {dimension_numbers = #tpu.dot_dimension_numbers<[2], [2], [0], [0], [0, 1, 0, 0, 1, 0], [1], [1]>} : vector<16x8x4xf32>, vector<8x8x4xf32>, vector<8x16x8xf32> -> vector<8x16x8xf32>
    "tpu.trace_stop"() : () -> ()
    %cst_31 = arith.constant dense<0xFF800000> : vector<8x16xf32>
    %50 = vector.multi_reduction <maximumf>, %49, %cst_31 [2] : vector<8x16x8xf32> to vector<8x16xf32>
    %51 = vector.shape_cast %50 : vector<8x16xf32> to vector<8x16x1xf32>
    %52 = vector.broadcast %51 : vector<8x16x1xf32> to vector<8x16x8xf32>
    %53 = arith.subf %49, %52 : vector<8x16x8xf32>
    %54 = math.exp %53 : vector<8x16x8xf32>
    %cst_32 = arith.constant dense<0.000000e+00> : vector<8x16xf32>
    %55 = vector.multi_reduction <add>, %54, %cst_32 [2] : vector<8x16x8xf32> to vector<8x16xf32>
    %56 = vector.shape_cast %55 : vector<8x16xf32> to vector<8x16x1xf32>
    %57 = vector.broadcast %56 : vector<8x16x1xf32> to vector<8x16x8xf32>
    %58 = arith.divf %54, %57 : vector<8x16x8xf32>
    "tpu.trace_start"() <{level = 10 : i32, message = "hqk,khd->qhd"}> : () -> ()
    %cst_33 = arith.constant dense<0.000000e+00> : vector<8x4x16xf32>
    %59 = tpu.matmul %19, %58, %cst_33 {dimension_numbers = #tpu.dot_dimension_numbers<[0], [2], [2], [1], [0, 1, 0, 2, 1, 1], [1], [0]>} : vector<8x8x4xf32>, vector<8x16x8xf32>, vector<8x4x16xf32> -> vector<8x4x16xf32>
    %60 = tpu.transpose %59, [2, 0, 1] : vector<8x4x16xf32> -> vector<16x8x4xf32>
    "tpu.trace_stop"() : () -> ()
    %61 = vector.shape_cast %60 : vector<16x8x4xf32> to vector<16x32xf32>
    %cst_34 = arith.constant dense<0.000000e+00> : vector<16x32xf32>
    %62 = tpu.matmul %61, %47, %cst_34 {dimension_numbers = #tpu.dot_dimension_numbers<[1], [0], [0], [1], [0, 0, 1, 1], [], []>} : vector<16x32xf32>, vector<32x32xf32>, vector<16x32xf32> -> vector<16x32xf32>
    %63 = vector.broadcast %48 : vector<1x32xf32> to vector<16x32xf32>
    %64 = arith.addf %62, %63 : vector<16x32xf32>
    %c0_35 = arith.constant 0 : index
    %c0_36 = arith.constant 0 : index
    %c0_37 = arith.constant 0 : index
    %65 = vector.load %arg12[%c0_35, %c0_36, %c0_37] : memref<1x16x32xf32, #tpu.memory_space<vmem>>, vector<1x16x32xf32>
    %66 = vector.shape_cast %65 : vector<1x16x32xf32> to vector<16x32xf32>
    %67 = vector.shape_cast %64 : vector<16x32xf32> to vector<1x16x32xf32>
    tpu.vector_store %arg12[%c0_35, %c0_36, %c0_37], %67 {strides = array<i32>} : memref<1x16x32xf32, #tpu.memory_space<vmem>>, vector<1x16x32xf32>,
    return
  }
  func.func @transform_0(%arg0: i32) -> (i32, i32, i32) {
    %c0_i32 = arith.constant 0 : i32
    %c0_i32_0 = arith.constant 0 : i32
    %c0_i32_1 = arith.constant 0 : i32
    return %arg0, %c0_i32, %c0_i32_0 : i32, i32, i32
  }
  func.func @transform_1(%arg0: i32) -> (i32, i32, i32) {
    %c0_i32 = arith.constant 0 : i32
    %c0_i32_0 = arith.constant 0 : i32
    %c0_i32_1 = arith.constant 0 : i32
    return %arg0, %c0_i32, %c0_i32_0 : i32, i32, i32
  }
  func.func @transform_2(%arg0: i32) -> (i32, i32) {
    %c0_i32 = arith.constant 0 : i32
    %c0_i32_0 = arith.constant 0 : i32
    %c0_i32_1 = arith.constant 0 : i32
    return %c0_i32, %c0_i32_0 : i32, i32
  }
  func.func @transform_3(%arg0: i32) -> (i32, i32) {
    %c0_i32 = arith.constant 0 : i32
    %c0_i32_0 = arith.constant 0 : i32
    %c0_i32_1 = arith.constant 0 : i32
    return %c0_i32, %c0_i32_0 : i32, i32
  }
  func.func @transform_4(%arg0: i32) -> (i32, i32) {
    %c0_i32 = arith.constant 0 : i32
    %c0_i32_0 = arith.constant 0 : i32
    %c0_i32_1 = arith.constant 0 : i32
    return %c0_i32, %c0_i32_0 : i32, i32
  }
  func.func @transform_5(%arg0: i32) -> (i32, i32) {
    %c0_i32 = arith.constant 0 : i32
    %c0_i32_0 = arith.constant 0 : i32
    %c0_i32_1 = arith.constant 0 : i32
    return %c0_i32, %c0_i32_0 : i32, i32
  }
  func.func @transform_6(%arg0: i32) -> (i32, i32) {
    %c0_i32 = arith.constant 0 : i32
    %c0_i32_0 = arith.constant 0 : i32
    %c0_i32_1 = arith.constant 0 : i32
    return %c0_i32, %c0_i32_0 : i32, i32
  }
  func.func @transform_7(%arg0: i32) -> (i32, i32) {
    %c0_i32 = arith.constant 0 : i32
    %c0_i32_0 = arith.constant 0 : i32
    %c0_i32_1 = arith.constant 0 : i32
    return %c0_i32, %c0_i32_0 : i32, i32
  }
  func.func @transform_8(%arg0: i32) -> (i32, i32) {
    %c0_i32 = arith.constant 0 : i32
    %c0_i32_0 = arith.constant 0 : i32
    %c0_i32_1 = arith.constant 0 : i32
    return %c0_i32, %c0_i32_0 : i32, i32
  }
  func.func @transform_9(%arg0: i32) -> (i32, i32) {
    %c0_i32 = arith.constant 0 : i32
    %c0_i32_0 = arith.constant 0 : i32
    %c0_i32_1 = arith.constant 0 : i32
    return %c0_i32, %c0_i32_0 : i32, i32
  }
  func.func @transform_10(%arg0: i32) -> (i32, i32, i32) {
    %c0_i32 = arith.constant 0 : i32
    %c0_i32_0 = arith.constant 0 : i32
    %c0_i32_1 = arith.constant 0 : i32
    return %arg0, %c0_i32, %c0_i32_0 : i32, i32, i32
  }
  func.func @transform_11(%arg0: i32) -> (i32, i32, i32) {
    %c0_i32 = arith.constant 0 : i32
    %c0_i32_0 = arith.constant 0 : i32
    %c0_i32_1 = arith.constant 0 : i32
    return %arg0, %c0_i32, %c0_i32_0 : i32, i32, i32
  }
}

</mosaic_0001>

<bundles_post_ra>
// kernel: co_attention.1
= control target key start
LH: loop header
LB: loop body
LE: loop exit
PB: predicated region body
PF: predicated region fallthrough
CT: control target
= control target key end

     0   :  { %s6949_s17 = smov 0   ;;  %s7822_s0 = inlined_call_operand.vmem [shape: f32[2,8,32], index: 0, kind: input, shape index: {}]   ;;  %s7823_s1 = inlined_call_operand.vmem [shape: f32[2,16,32], index: 1, kind: input, shape index: {}]   ;;  %s7824_s2 = inlined_call_operand.vmem [shape: f32[32,96], index: 2, kind: input, shape index: {}]   ;;  %s7825_s3 = inlined_call_operand.vmem [shape: f32[1,96], index: 3, kind: input, shape index: {}]   ;;  %s7826_s4 = inlined_call_operand.vmem [shape: f32[32,96], index: 4, kind: input, shape index: {}]   ;;  %s7827_s5 = inlined_call_operand.vmem [shape: f32[1,96], index: 5, kind: input, shape index: {}]   ;;  %s7828_s6 = inlined_call_operand.vmem [shape: f32[32,32], index: 6, kind: input, shape index: {}]   ;;  %s7829_s7 = inlined_call_operand.vmem [shape: f32[1,32], index: 7, kind: input, shape index: {}]   ;;  %s7830_s8 = inlined_call_operand.vmem [shape: f32[32,32], index: 8, kind: input, shape index: {}]   ;;  %s7831_s9 = inlined_call_operand.vmem [shape: f32[1,32], index: 9, kind: input, shape index: {}]   ;;  %s7832_s10 = inlined_call_operand.vmem [shape: f32[2,8,32], index: 10, kind: output, shape index: {0}]   ;;  %s7833_s11 = inlined_call_operand.vmem [shape: f32[2,16,32], index: 11, kind: output, shape index: {1}]  }
   0x1 LB: > { %s6286_s18 = sadd.s32 4294967295, %s6867_s17   ;;  %p6290_p0 = scmp.ge.s32.totalorder %s6867_s17, 1  ;;  %s6867_s17 = sphi %s6949_s17, %s22_s17  }
   0x2   : > { %p349_p1 = scmp.lt.s32.totalorder %s6867_s17, 3 }
   0x4   : > { %p350_p2 = pnand %p6290_p0, %p349_p1 }
   0x5   : > { %p397_p3 = scmp.lt.s32.totalorder (!%p350_p2), %s6286_s18, 1  ;;  %s6871_s28 = smov (!%p350_p2), 116  }
   0x6   : > { %353 = sbr.rel (%p350_p2) target bundleno = 3258 (0xcba), region = 60  ;;  %s6872_s29 = smov (!%p350_p2), 124  }
   0x7   : > { %s6873_s30 = smov (!%p350_p2), 108   ;;  %s6874_s12 = smov (!%p350_p2), 120  }
   0x8   : > { %s6875_s13 = smov (!%p350_p2), 112   ;;  %s6876_s16 = smov (!%p350_p2), 100  }
   0x9   : > { %s6877_s19 = smov (!%p350_p2), 104   ;;  %s6878_s22 = smov (!%p350_p2), 96  }
   0xa   : > { %s6879_s23 = smov (!%p350_p2), 64   ;;  %s6886_s21 = smov (!%p350_p2), 16  }
   0xb   : > { %v506_v0 = vld [vmem:[%s7826_s4 + $0x18] sm:$0xff]  ;;  %v505_v1 = vld [vmem:[%s7826_s4 + $0x10] sm:$0xff]  ;;  %v6869_v2 = vmov 0.0   ;;  %v504_v5 = vld [vmem:[%s7826_s4 + $0x8] sm:$0xff]  ;;  %s7835_s18 = smov (!%p397_p3, %s6286_s18), 1  ;;  %vm429_vm0 = vcmask 261120  }
   0xc   : > { %6528 = vmatprep.subr.mxu1 %v506_v0  ;;  %6517 = vmatprep.subr.mxu0 %v6869_v2  ;;  %v421_v3 = vld [vmem:[%s7824_s2 + $0x18] sm:$0xff]  ;;  %v420_v4 = vld [vmem:[%s7824_s2 + $0x10] sm:$0xff]  ;;  %v419_v6 = vld [vmem:[%s7824_s2 + $0x8] sm:$0xff]  ;;  %s6413_s14 = sshll.u32 %s7835_s18, 4  ;;  %s6291_s15 = sshll.u32 %s7835_s18, 3  ;;  %vm6870_vm1 = vmmov 0  }
   0xd   : > { %6529 = vmatpush3.msra.mxu1 %v506_v0  ;;  %6518 = vmatpush3.msra.mxu0 %v421_v3  ;;  %v503_v7 = vld [vmem:[%s7826_s4] sm:$0xff]  ;;  %s405_s20 = scalar_lea.vmem %s7823_s1, %s6413_s14  ;;  %s400_s25 = scalar_lea.vmem %s7822_s0, %s6291_s15  ;;  %vm952_vm2 = vcmask 1043456   ;;  %vm949_vm3 = vcmask 31744   ;;  %vm1551_vm4 = vcmask 130048   ;;  %vm3109_vm5 = vcmask 64512  }
   0xe   : > { %6530 = vmatprep.subr.mxu1 %v505_v1  ;;  %6519 = vmatprep.subr.mxu0 %v6869_v2  ;;  %v416_v8 = vld [vmem:[%s405_s20] sm:$0xff]  ;;  %v417_v9 = vld [vmem:[%s405_s20 + $0x8] sm:$0xff]  ;;  %s6885_s20 = smov 20   ;;  %s6888_s24 = smov 24   ;;  %vm3111_vm6 = vcmask 97280   ;;  %vm3114_vm7 = vcmask 162816  }
   0xf   : > { %6531 = vmatpush3.msra.mxu1 %v505_v1  ;;  %6520 = vmatpush3.msra.mxu0 %v420_v4  ;;  %v418_v10 = vld [vmem:[%s7824_s2] sm:$0xff]  ;;  %vm3116_vm8 = vcmask 195584   ;;  %vm3118_vm9 = vcmask 228352   ;;  %s414_s26 = scalar_lea.vmem %s7833_s11, %s6413_s14 }
  0x10   : > { %6532 = vmatprep.subr.mxu1 %v504_v5  ;;  %6521 = vmatprep.subr.mxu0 %v6869_v2  ;;  %v415_v11 = vld [vmem:[%s400_s25] sm:$0xff] }
  0x11   : > { %6533 = vmatpush3.msra.mxu1 %v504_v5  ;;  %6522 = vmatpush3.msra.mxu0 %v419_v6  ;;  %v6299_v12 = vld [vmem:[%s7827_s5] ss:$0 sm:$0xff] }
  0x12   : > { %6534 = vmatprep.subr.mxu1 %v503_v7  ;;  %6536 = vmatprep.mubr.msk.f32.mxu1 %vm429_vm0, %v416_v8  ;;  %v6297_v19 = vld [vmem:[%s7825_s3] ss:$0 sm:$0xff] }
  0x13   : > { %6535 = vmatpush3.msra.mxu1 %v503_v7  ;;  %6523 = vmatprep.subr.mxu0 %v6869_v2 }
  0x14   : > { %6537 = vmatmul.mubr.msk.f32.vlgmr.msra.gmra.mxu1 %vm429_vm0, %v417_v9  ;;  %6524 = vmatpush3.msra.mxu0 %v418_v10 }
  0x15   : > { %6525 = vmatprep.mubr.msk.f32.mxu0 %vm6870_vm1, %v6869_v2  ;;  %6539 = vmatprep.subr.mxu1 %v6869_v2 }
  0x16   : > { %6526 = vmatmul.mubr.msk.f32.vlgmr.msra.gmra.mxu0 %vm429_vm0, %v415_v11  ;;  %6541 = vmatprep.mubr.msk.f32.mxu1 %vm6870_vm1, %v6869_v2 }
  0x17   : > { %6549 = vmatprep.subr.mxu0 %v6869_v2  ;;  %6551 = vmatprep.mubr.msk.f32.mxu0 %vm6870_vm1, %v6869_v2 }
  0xd4   : > { %v6538_v13 = vpop.f32.mrf.mxu1 }
  0xd5   : > { %v7013_v14 = vadd.f32 %v6538_v13, %v6299_v12 }
  0xd6   : > { %v499_v15 = vpop.f32.mrf.mxu0  ;;  %v586_v17 = vpop.f32.mrf.mxu1 }
  0xd7   : > { %622 = vrot.lane.b32.xlu1 %v7013_v14, %s6871_s28  ;;  %614 = vrot.lane.b32.xlu0 %v7013_v14, %s6872_s29  ;;  %v7019_v18 = vadd.f32 %v6299_v12, %v586_v17  ;;  %v7036_v20 = vadd.f32 %v6297_v19, %v499_v15 }
  0xd8   : > { %v6527_v16 = vpop.f32.mrf.mxu0 }
  0xdb   : > { %630 = vrot.lane.b32.xlu1 %v7013_v14, %s6873_s30  ;;  %618 = vrot.lane.b32.xlu0 %v7013_v14, %s6874_s12 }
  0xdf   : > { %616 = vrot.lane.b32.xlu1 %v7019_v18, %s6874_s12  ;;  %612 = vrot.lane.b32.xlu0 %v7019_v18, %s6872_s29 }
  0xe3   : > { %620 = vrot.lane.b32.xlu1 %v7019_v18, %s6871_s28  ;;  %626 = vrot.lane.b32.xlu0 %v7013_v14, %s6875_s13 }
  0xe7   : > { %628 = vrot.lane.b32.xlu1 %v7019_v18, %s6873_s30  ;;  %624 = vrot.lane.b32.xlu0 %v7019_v18, %s6875_s13 }
  0xeb   : > { %636 = vrot.lane.b32.xlu1 %v7019_v18, %s6876_s16  ;;  %632 = vrot.lane.b32.xlu0 %v7019_v18, %s6877_s19 }
  0xef   : > { %638 = vrot.lane.b32.xlu1 %v7013_v14, %s6876_s16  ;;  %634 = vrot.lane.b32.xlu0 %v7013_v14, %s6877_s19 }
  0xf3   : > { %647 = vrot.lane.b32.xlu1 %v7013_v14, %s6878_s22  ;;  %596 = vrot.lane.b32.xlu0 %v7036_v20, %s6872_s29  ;;  %s409_s29 = scalar_lea.vmem %s7832_s10, %s6291_s15 }
  0xf7   : > { %600 = vrot.lane.b32.xlu0 %v7036_v20, %s6871_s28  ;;  %598 = vrot.lane.b32.xlu1 %v7036_v20, %s6874_s12 }
  0xfb   : > { %604 = vrot.lane.b32.xlu0 %v7036_v20, %s6873_s30  ;;  %602 = vrot.lane.b32.xlu1 %v7036_v20, %s6875_s13  ;;  %s6882_s13 = smov 4  }
  0xff   : > { %645 = vrot.lane.b32.xlu0 %v7019_v18, %s6878_s22  ;;  %606 = vrot.lane.b32.xlu1 %v7036_v20, %s6877_s19  ;;  %s6884_s19 = smov 12  }
 0x149   : > { %v7048_v21 = vpop.permute.xlu1 %622  ;;  %v7050_v22 = vpop.permute.xlu0 %614 }
 0x14a   : > { %651 = vrot.lane.b32.xlu1 %v7050_v22, %s6878_s22 }
 0x14d   : > { %v7054_v23 = vpop.permute.xlu1 %630  ;;  %v7056_v24 = vpop.permute.xlu0 %618 }
 0x14e   : > { %659 = vrot.lane.b32.xlu1 %v7048_v21, %s6878_s22  ;;  %655 = vrot.lane.b32.xlu0 %v7056_v24, %s6878_s22 }
 0x151   : > { %v7062_v25 = vpop.permute.xlu1 %616  ;;  %v7064_v26 = vpop.permute.xlu0 %612 }
 0x152   : > { %667 = vrot.lane.b32.xlu1 %v7054_v23, %s6878_s22 }
 0x155   : > { %v7068_v27 = vpop.permute.xlu1 %620  ;;  %v7070_v28 = vpop.permute.xlu0 %626 }
 0x156   : > { %663 = vrot.lane.b32.xlu0 %v7070_v28, %s6878_s22 }
 0x159   : > { %v7074_v29 = vpop.permute.xlu1 %628  ;;  %v7076_v30 = vpop.permute.xlu0 %624 }
 0x15d   : > { %v7078_v31 = vpop.permute.xlu1 %636  ;;  %v7080_v32 = vpop.permute.xlu0 %632 }
 0x161   : > { %v7082_v33 = vpop.permute.xlu1 %638  ;;  %v7084_v34 = vpop.permute.xlu0 %634 }
 0x162   : > { %675 = vrot.lane.b32.xlu1 %v7082_v33, %s6878_s22  ;;  %671 = vrot.lane.b32.xlu0 %v7084_v34, %s6878_s22 }
 0x165   : > { %v7106_v35 = vpop.permute.xlu0 %596  ;;  %v648_v39 = vpop.permute.xlu1 %647 }
 0x166   : > { %657 = vrot.lane.b32.xlu1 %v7068_v27, %s6878_s22  ;;  %649 = vrot.lane.b32.xlu0 %v7064_v26, %s6878_s22 }
 0x169   : > { %v7108_v36 = vpop.permute.xlu0 %600  ;;  %v7112_v40 = vpop.permute.xlu1 %598 }
 0x16a   : > { %665 = vrot.lane.b32.xlu1 %v7074_v29, %s6878_s22  ;;  %653 = vrot.lane.b32.xlu0 %v7062_v25, %s6878_s22 }
 0x16d   : > { %v7110_v37 = vpop.permute.xlu0 %604  ;;  %v7114_v41 = vpop.permute.xlu1 %602 }
 0x16e   : > { %673 = vrot.lane.b32.xlu1 %v7078_v31, %s6878_s22  ;;  %661 = vrot.lane.b32.xlu0 %v7076_v30, %s6878_s22 }
 0x171   : > { %v646_v38 = vpop.permute.xlu0 %645  ;;  %v7116_v42 = vpop.permute.xlu1 %606 }
 0x172   : > { %669 = vrot.lane.b32.xlu0 %v7080_v32, %s6878_s22 }
 0x176   : > { %608 = vrot.lane.b32.xlu0 %v7036_v20, %s6876_s16  ;;  %s6883_s16 = smov 8  }
 0x197   : > { %693 = vxpose.xlu1.b32.start [1/2] (short) (narrow) %v646_v38, 8 }
 0x19b   : > { %694 = vxpose.xlu1.b32.end [2/2] (short) (narrow) %v648_v39, 8 }
 0x1bc   : > { %v652_v43 = vpop.permute.xlu1 %651 }
 0x1c0   : > { %v660_v44 = vpop.permute.xlu1 %659  ;;  %v656_v45 = vpop.permute.xlu0 %655 }
 0x1c4   : > { %v668_v46 = vpop.permute.xlu1 %667 }
 0x1c8   : > { %v664_v47 = vpop.permute.xlu0 %663 }
 0x1d4   : > { %v676_v48 = vpop.permute.xlu1 %675  ;;  %v672_v49 = vpop.permute.xlu0 %671 }
 0x1d8   : > { %v658_v50 = vpop.permute.xlu1 %657  ;;  %v650_v51 = vpop.permute.xlu0 %649 }
 0x1d9   : > { %789 = vxpose.xlu1.b32.start [1/2] (short) (narrow) %v658_v50, 8  ;;  %725 = vxpose.xlu0.b32.start [1/2] (short) (narrow) %v650_v51, 8 }
 0x1dc   : > { %v666_v52 = vpop.permute.xlu1 %665  ;;  %v654_v53 = vpop.permute.xlu0 %653 }
 0x1dd   : > { %790 = vxpose.xlu1.b32.end [2/2] (short) (narrow) %v660_v44, 8  ;;  %726 = vxpose.xlu0.b32.end [2/2] (short) (narrow) %v652_v43, 8 }
 0x1e0   : > { %v674_v54 = vpop.permute.xlu1 %673  ;;  %v662_v55 = vpop.permute.xlu0 %661 }
 0x1e1   : > { %853 = vxpose.xlu1.b32.start [1/2] (short) (narrow) %v666_v52, 8  ;;  %757 = vxpose.xlu0.b32.start [1/2] (short) (narrow) %v654_v53, 8 }
 0x1e4   : > { %v670_v56 = vpop.permute.xlu0 %669 }
 0x1e5   : > { %854 = vxpose.xlu1.b32.end [2/2] (short) (narrow) %v668_v46, 8  ;;  %758 = vxpose.xlu0.b32.end [2/2] (short) (narrow) %v656_v45, 8 }
 0x1e8   : > { %v7134_v58 = vpop.permute.xlu0 %608 }
 0x1e9   : > { %917 = vxpose.xlu1.b32.start [1/2] (short) (narrow) %v674_v54, 8  ;;  %821 = vxpose.xlu0.b32.start [1/2] (short) (narrow) %v662_v55, 8 }
 0x1ed   : > { %918 = vxpose.xlu1.b32.end [2/2] (short) (narrow) %v676_v48, 8  ;;  %822 = vxpose.xlu0.b32.end [2/2] (short) (narrow) %v664_v47, 8 }
 0x1f1   : > { %885 = vxpose.xlu0.b32.start [1/2] (short) (narrow) %v670_v56, 8 }
 0x1f5   : > { %886 = vxpose.xlu0.b32.end [2/2] (short) (narrow) %v672_v49, 8 }
 0x20b   : > { %1644 = vrot.lane.b32.xlu1 %v7064_v26, %s6879_s23 }
 0x20f   : > { %1642 = vrot.lane.b32.xlu1 %v7013_v14, %s6879_s23 }
 0x213   : > { %1652 = vrot.lane.b32.xlu1 %v7068_v27, %s6879_s23  ;;  %v709_v57 = vpop.trf.xlu1 }
 0x214   : > { %6540 = vmatpush3.msk.msra.mxu1 %vm952_vm2, %v709_v57 }
 0x215   : > { %6542 = vmatmul.mubr.msk.f32.vlgmr.msra.gmra.mxu1 %vm949_vm3, %v7036_v20  ;;  %6544 = vmatprep.subr.mxu1 %v6869_v2 }
 0x216   : > { %6546 = vmatprep.mubr.msk.f32.mxu1 %vm6870_vm1, %v6869_v2 }
 0x217   : > { %1650 = vrot.lane.b32.xlu1 %v7056_v24, %s6879_s23 }
 0x21e   : > { %1640 = vrot.lane.b32.xlu0 %v7019_v18, %s6879_s23 }
 0x255   : > { %v741_v59 = vpop.trf.xlu0  ;;  %v805_v60 = vpop.trf.xlu1 }
 0x256   : > { %6545 = vmatpush3.msk.msra.mxu1 %vm952_vm2, %v741_v59 }
 0x257   : > { %6547 = vmatmul.mubr.msk.f32.vlgmr.msra.gmra.mxu1 %vm949_vm3, %v7106_v35  ;;  %6554 = vmatprep.subr.mxu1 %v6869_v2 }
 0x258   : > { %6555 = vmatpush3.msk.msra.mxu1 %vm952_vm2, %v805_v60  ;;  %6556 = vmatprep.mubr.msk.f32.mxu1 %vm6870_vm1, %v6869_v2 }
 0x259   : > { %6564 = vmatprep.subr.mxu1 %v6869_v2 }
 0x25b   : > { %6557 = vmatmul.mubr.msk.f32.vlgmr.msra.gmra.mxu1 %vm949_vm3, %v7108_v36 }
 0x25c   : > { %6566 = vmatprep.mubr.msk.f32.mxu1 %vm6870_vm1, %v6869_v2 }
 0x25d   : > { %v869_v61 = vpop.trf.xlu1  ;;  %v773_v62 = vpop.trf.xlu0 }
 0x25e   : > { %6550 = vmatpush3.msk.msra.mxu0 %vm952_vm2, %v773_v62  ;;  %6565 = vmatpush3.msk.msra.mxu1 %vm952_vm2, %v869_v61 }
 0x25f   : > { %6552 = vmatmul.mubr.msk.f32.vlgmr.msra.gmra.mxu0 %vm949_vm3, %v7112_v40  ;;  %6567 = vmatmul.mubr.msk.f32.vlgmr.msra.gmra.mxu1 %vm949_vm3, %v7110_v37 }
 0x260   : > { %6559 = vmatprep.subr.mxu0 %v6869_v2  ;;  %6574 = vmatprep.subr.mxu1 %v6869_v2 }
 0x261   : > { %6561 = vmatprep.mubr.msk.f32.mxu0 %vm6870_vm1, %v6869_v2  ;;  %6576 = vmatprep.mubr.msk.f32.mxu1 %vm6870_vm1, %v6869_v2 }
 0x265   : > { %v933_v63 = vpop.trf.xlu1  ;;  %v837_v0 = vpop.trf.xlu0 }
 0x266   : > { %6560 = vmatpush3.msk.msra.mxu0 %vm952_vm2, %v837_v0  ;;  %6575 = vmatpush3.msk.msra.mxu1 %vm952_vm2, %v933_v63 }
 0x267   : > { %6562 = vmatmul.mubr.msk.f32.vlgmr.msra.gmra.mxu0 %vm949_vm3, %v7114_v41  ;;  %6577 = vmatmul.mubr.msk.f32.vlgmr.msra.gmra.mxu1 %vm949_vm3, %v7134_v58 }
 0x268   : > { %6569 = vmatprep.subr.mxu0 %v6869_v2  ;;  %6571 = vmatprep.mubr.msk.f32.mxu0 %vm6870_vm1, %v6869_v2 }
 0x269   : > { %6584 = vmatprep.subr.mxu1 %v6869_v2  ;;  %6586 = vmatprep.mubr.msk.f32.mxu1 %vm6870_vm1, %v6869_v2 }
 0x26d   : > { %v901_v1 = vpop.trf.xlu0 }
 0x26e   : > { %6570 = vmatpush3.msk.msra.mxu0 %vm952_vm2, %v901_v1 }
 0x26f   : > { %6572 = vmatmul.mubr.msk.f32.vlgmr.msra.gmra.mxu0 %vm949_vm3, %v7116_v42  ;;  %6579 = vmatprep.subr.mxu0 %v6869_v2 }
 0x270   : > { %6581 = vmatprep.mubr.msk.f32.mxu0 %vm6870_vm1, %v6869_v2 }
 0x27d   : > { %v1645_v3 = vpop.permute.xlu1 %1644 }
 0x27e   : > { %1720 = vxpose.xlu1.b32.start [1/2] (short) (narrow) %v1645_v3, 8 }
 0x281   : > { %v1643_v5 = vpop.permute.xlu1 %1642 }
 0x285   : > { %v1653_v52 = vpop.permute.xlu1 %1652 }
 0x289   : > { %v1651_v56 = vpop.permute.xlu1 %1650 }
 0x290   : > { %v1641_v4 = vpop.permute.xlu0 %1640 }
 0x291   : > { %1688 = vxpose.xlu0.b32.start [1/2] (short) (narrow) %v1641_v4, 8 }
 0x295   : > { %1689 = vxpose.xlu0.b32.end [2/2] (short) (narrow) %v1643_v5, 8 }
 0x2be   : > { %1646 = vrot.lane.b32.xlu0 %v7050_v22, %s6879_s23 }
 0x2c2   : > { %1648 = vrot.lane.b32.xlu0 %v7062_v25, %s6879_s23 }
 0x2d5   : > { %v7182_v6 = vpop.f32.mrf.mxu1 }
 0x2d6   : > { %v1552_v8 = vsel %vm1551_vm4, %v7182_v6, -inf }
 0x2d7   : > { %v6543_v7 = vpop.f32.mrf.mxu1 }
 0x2e1   : > { %1553 = vmax.xlane.f32.xlu0 %v1552_v8 }
 0x30d   : > { %v7194_v46 = vpop.trf.xlu0 }
 0x317   : > { %v1097_v9 = vpop.f32.mrf.mxu1 }
 0x318   : > { %v1555_v51 = vsel %vm1551_vm4, %v1097_v9, -inf }
 0x319   : > { %v6548_v10 = vpop.f32.mrf.mxu1 }
 0x31b   : > { %v1247_v11 = vpop.f32.mrf.mxu1 }
 0x31c   : > { %v1561_v53 = vsel %vm1551_vm4, %v1247_v11, -inf }
 0x31d   : > { %v6558_v12 = vpop.f32.mrf.mxu1 }
 0x31f   : > { %v7186_v13 = vpop.f32.mrf.mxu0  ;;  %v1397_v15 = vpop.f32.mrf.mxu1 }
 0x320   : > { %v1558_v16 = vsel %vm1551_vm4, %v7186_v13, -inf  ;;  %v1567_v55 = vsel %vm1551_vm4, %v1397_v15, -inf }
 0x321   : > { %v6568_v17 = vpop.f32.mrf.mxu1  ;;  %1559 = vmax.xlane.f32.xlu0 %v1558_v16  ;;  %v6553_v19 = vpop.f32.mrf.mxu0 }
 0x327   : > { %v7190_v38 = vpop.f32.mrf.mxu0  ;;  %v1547_v39 = vpop.f32.mrf.mxu1 }
 0x328   : > { %v1564_v43 = vsel %vm1551_vm4, %v7190_v38, -inf  ;;  %v1573_v57 = vsel %vm1551_vm4, %v1547_v39, -inf }
 0x329   : > { %v6578_v44 = vpop.f32.mrf.mxu1  ;;  %1565 = vmax.xlane.f32.xlu0 %v1564_v43  ;;  %v6563_v45 = vpop.f32.mrf.mxu0 }
 0x32f   : > { %v7196_v47 = vpop.f32.mrf.mxu0 }
 0x330   : > { %v1647_v48 = vpop.permute.xlu0 %1646  ;;  %v1570_v49 = vsel %vm1551_vm4, %v7196_v47, -inf }
 0x331   : > { %1721 = vxpose.xlu1.b32.end [2/2] (short) (narrow) %v1647_v48, 8  ;;  %1571 = vmax.xlane.f32.xlu0 %v1570_v49  ;;  %v6573_v50 = vpop.f32.mrf.mxu0 }
 0x334   : > { %v1649_v54 = vpop.permute.xlu0 %1648 }
 0x358   : > { %1556 = vmax.xlane.f32.xlu1 %v1555_v51 }
 0x35c   : > { %1562 = vmax.xlane.f32.xlu1 %v1561_v53 }
 0x35e   : > { %1752 = vxpose.xlu0.b32.start [1/2] (short) (narrow) %v1649_v54, 8 }
 0x360   : > { %1568 = vmax.xlane.f32.xlu1 %v1567_v55 }
 0x362   : > { %1753 = vxpose.xlu0.b32.end [2/2] (short) (narrow) %v1651_v56, 8 }
 0x364   : > { %1574 = vmax.xlane.f32.xlu1 %v1573_v57 }
 0x36a   : > { %v1554_v1 = vpop.xlane.xlu0 %1553 }
 0x38b   : > { %1654 = vrot.lane.b32.xlu0 %v7048_v21, %s6879_s23 }
 0x38f   : > { %1656 = vrot.lane.b32.xlu0 %v7076_v30, %s6879_s23 }
 0x393   : > { %1662 = vrot.lane.b32.xlu0 %v7054_v23, %s6879_s23 }
 0x397   : > { %1784 = vxpose.xlu1.b32.start [1/2] (short) (narrow) %v1653_v52, 8  ;;  %1664 = vrot.lane.b32.xlu0 %v7080_v32, %s6879_s23  ;;  %v1576_v52 = vsub.f32 %v7182_v6, %v1554_v1 }
 0x399   : > { %v1584_v53 = vmul.f32 1.442695, %v1576_v52 }
 0x39b   : > { %1670 = vrot.lane.b32.xlu0 %v7082_v33, %s6879_s23 }
 0x3a9   : > { %v7214_v59 = vpop.trf.xlu1 }
 0x3aa   : > { %v1560_v7 = vpop.xlane.xlu0 %1559 }
 0x3ab   : > { %v1578_v54 = vsub.f32 %v7186_v13, %v1560_v7 }
 0x3ad   : > { %v1588_v55 = vmul.f32 1.442695, %v1578_v54 }
 0x3b2   : > { %v1566_v16 = vpop.xlane.xlu0 %1565 }
 0x3b3   : > { %v1580_v56 = vsub.f32 %v7190_v38, %v1566_v16 }
 0x3b5   : > { %v1592_v57 = vmul.f32 1.442695, %v1580_v56 }
 0x3ba   : > { %v1572_v43 = vpop.xlane.xlu0 %1571 }
 0x3e1   : > { %v1557_v60 = vpop.xlane.xlu1 %1556 }
 0x3e2   : > { %v1577_v61 = vsub.f32 %v1097_v9, %v1557_v60  ;;  %v1582_v60 = vsub.f32 %v7196_v47, %v1572_v43 }
 0x3e4   : > { %v1586_v62 = vmul.f32 1.442695, %v1577_v61  ;;  %v1596_v61 = vmul.f32 1.442695, %v1582_v60 }
 0x3e5   : > { %v1563_v63 = vpop.xlane.xlu1 %1562 }
 0x3e6   : > { %6765 = vpow2.f32 %v1586_v62  ;;  %v1579_v0 = vsub.f32 %v1247_v11, %v1563_v63  ;;  %v7217_v11 = vpop.trf.xlu0 }
 0x3e8   : > { %v1590_v3 = vmul.f32 1.442695, %v1579_v0 }
 0x3e9   : > { %v1569_v4 = vpop.xlane.xlu1 %1568 }
 0x3ea   : > { %6767 = vpow2.f32 %v1590_v3  ;;  %v1581_v5 = vsub.f32 %v1397_v15, %v1569_v4 }
 0x3ec   : > { %v1594_v8 = vmul.f32 1.442695, %v1581_v5 }
 0x3ed   : > { %v1575_v10 = vpop.xlane.xlu1 %1574 }
 0x3ee   : > { %6769 = vpow2.f32 %v1594_v8  ;;  %v1583_v12 = vsub.f32 %v1547_v39, %v1575_v10 }
 0x3f0   : > { %v1598_v17 = vmul.f32 1.442695, %v1583_v12 }
 0x3f2   : > { %6771 = vpow2.f32 %v1598_v17 }
 0x3f3   : > { %v6766_v19 = vpop.eup %6765  ;;  %6773 = vpow2.f32 %v1584_v53 }
 0x3f4   : > { %v1603_v9 = vsel %vm1551_vm4, %v6766_v19, 0.0  ;;  %6775 = vpow2.f32 %v1588_v55 }
 0x3f5   : > { %1604 = vadd.xlane.f32.xlu0 %v1603_v9  ;;  %6777 = vpow2.f32 %v1592_v57 }
 0x3f6   : > { %6779 = vpow2.f32 %v1596_v61 }
 0x3f7   : > { %v6768_v44 = vpop.eup %6767 }
 0x3f8   : > { %v1609_v45 = vsel %vm1551_vm4, %v6768_v44, 0.0 }
 0x3f9   : > { %1610 = vadd.xlane.f32.xlu0 %v1609_v45 }
 0x3fb   : > { %v7220_v15 = vpop.eup %6769 }
 0x3fc   : > { %v1615_v48 = vsel %vm1551_vm4, %v7220_v15, 0.0 }
 0x3fd   : > { %1616 = vadd.xlane.f32.xlu0 %v1615_v48  ;;  %v1655_v39 = vpop.permute.xlu0 %1654 }
 0x3fe   : > { %1785 = vxpose.xlu1.b32.end [2/2] (short) (narrow) %v1655_v39, 8 }
 0x3ff   : > { %v7224_v49 = vpop.eup %6771 }
 0x400   : > { %v1621_v50 = vsel %vm1551_vm4, %v7224_v49, 0.0  ;;  %v6774_v62 = vpop.eup %6773 }
 0x401   : > { %1622 = vadd.xlane.f32.xlu0 %v1621_v50  ;;  %v1657_v51 = vpop.permute.xlu0 %1656  ;;  %v1600_v63 = vsel %vm1551_vm4, %v6774_v62, 0.0  ;;  %v7241_v0 = vpop.eup %6775 }
 0x402   : > { %v1606_v6 = vsel %vm1551_vm4, %v7241_v0, 0.0  ;;  %v7245_v13 = vpop.eup %6777 }
 0x403   : > { %v1612_v38 = vsel %vm1551_vm4, %v7245_v13, 0.0  ;;  %v7249_v1 = vpop.eup %6779 }
 0x404   : > { %v1618_v47 = vsel %vm1551_vm4, %v7249_v1, 0.0 }
 0x405   : > { %v1663_v3 = vpop.permute.xlu0 %1662 }
 0x409   : > { %v1665_v4 = vpop.permute.xlu0 %1664 }
 0x40d   : > { %v1671_v5 = vpop.permute.xlu0 %1670 }
 0x41c   : > { %1660 = vrot.lane.b32.xlu1 %v7074_v29, %s6879_s23 }
 0x420   : > { %1658 = vrot.lane.b32.xlu1 %v7070_v28, %s6879_s23 }
 0x424   : > { %1668 = vrot.lane.b32.xlu1 %v7078_v31, %s6879_s23 }
 0x428   : > { %1666 = vrot.lane.b32.xlu1 %v7084_v34, %s6879_s23 }
 0x42e   : > { %1816 = vxpose.xlu0.b32.start [1/2] (short) (narrow) %v1657_v51, 8 }
 0x44c   : > { %1601 = vadd.xlane.f32.xlu1 %v1600_v63 }
 0x450   : > { %1607 = vadd.xlane.f32.xlu1 %v1606_v6 }
 0x454   : > { %1613 = vadd.xlane.f32.xlu1 %v1612_v38 }
 0x458   : > { %1619 = vadd.xlane.f32.xlu1 %v1618_v47 }
 0x476   : > { %v1800_v12 = vpop.trf.xlu1 }
 0x47e   : > { %v1605_v7 = vpop.xlane.xlu0 %1604 }
 0x47f   : > { %6781 = vrcp.f32 %v1605_v7 }
 0x482   : > { %v1611_v8 = vpop.xlane.xlu0 %1610 }
 0x483   : > { %6783 = vrcp.f32 %v1611_v8 }
 0x486   : > { %v1617_v10 = vpop.xlane.xlu0 %1616 }
 0x487   : > { %6785 = vrcp.f32 %v1617_v10 }
 0x48c   : > { %v6782_v16 = vpop.eup %6781 }
 0x48d   : > { %v1627_v17 = vmul.f32 %v6782_v16, %v6766_v19 }
 0x48e   : > { %v1661_v43 = vpop.permute.xlu1 %1660 }
 0x48f   : > { %1848 = vxpose.xlu1.b32.start [1/2] (short) (narrow) %v1661_v43, 8  ;;  %6585 = vmatpush3.xpose.msk.msra.mxu1 %vm1551_vm4, %v1627_v17 }
 0x490   : > { %v6784_v9 = vpop.eup %6783  ;;  %6594 = vmatprep.subr.mxu1 %v6869_v2 }
 0x491   : > { %v1631_v45 = vmul.f32 %v6784_v9, %v6768_v44 }
 0x492   : > { %v1659_v48 = vpop.permute.xlu1 %1658  ;;  %6587 = vmatmul.mubr.msk.f32.vlgmr.msra.gmra.mxu1 %vm1551_vm4, %v7214_v59 }
 0x493   : > { %1817 = vxpose.xlu0.b32.end [2/2] (short) (narrow) %v1659_v48, 8  ;;  %1849 = vxpose.xlu1.b32.end [2/2] (short) (narrow) %v1663_v3, 8 }
 0x494   : > { %v6786_v39 = vpop.eup %6785  ;;  %6595 = vmatpush3.xpose.msk.msra.mxu1 %vm1551_vm4, %v1631_v45  ;;  %6596 = vmatprep.mubr.msk.f32.mxu1 %vm6870_vm1, %v6869_v2 }
 0x495   : > { %6604 = vmatprep.subr.mxu1 %v6869_v2  ;;  %v1635_v19 = vmul.f32 %v6786_v39, %v7220_v15 }
 0x496   : > { %v1669_v50 = vpop.permute.xlu1 %1668 }
 0x497   : > { %6597 = vmatmul.mubr.msk.f32.vlgmr.msra.gmra.mxu1 %vm1551_vm4, %v1800_v12  ;;  %1912 = vxpose.xlu1.b32.start [1/2] (short) (narrow) %v1669_v50, 8 }
 0x498   : > { %1880 = vxpose.xlu0.b32.start [1/2] (short) (narrow) %v1665_v4, 8  ;;  %6605 = vmatpush3.xpose.msk.msra.mxu1 %vm1551_vm4, %v1635_v19 }
 0x499   : > { %6606 = vmatprep.mubr.msk.f32.mxu1 %vm6870_vm1, %v6869_v2  ;;  %6614 = vmatprep.subr.mxu1 %v6869_v2 }
 0x49a   : > { %v1667_v59 = vpop.permute.xlu1 %1666 }
 0x49b   : > { %1913 = vxpose.xlu1.b32.end [2/2] (short) (narrow) %v1671_v5, 8 }
 0x49c   : > { %1881 = vxpose.xlu0.b32.end [2/2] (short) (narrow) %v1667_v59, 8 }
 0x4b9   : > { %3205 = vrot.lane.b32.xlu1 %v7036_v20, %s6878_s22 }
 0x4bd   : > { %3209 = vrot.lane.b32.xlu1 %v7112_v40, %s6878_s22 }
 0x4c1   : > { %3211 = vrot.lane.b32.xlu1 %v7108_v36, %s6878_s22 }
 0x4c5   : > { %3207 = vrot.lane.b32.xlu0 %v7106_v35, %s6878_s22 }
 0x4c9   : > { %3215 = vrot.lane.b32.xlu0 %v7110_v37, %s6878_s22 }
 0x4d5   : > { %v1602_v44 = vpop.xlane.xlu1 %1601 }
 0x4d6   : > { %6787 = vrcp.f32 %v1602_v44 }
 0x4d9   : > { %v1608_v15 = vpop.xlane.xlu1 %1607 }
 0x4da   : > { %6789 = vrcp.f32 %v1608_v15 }
 0x4dd   : > { %v1614_v51 = vpop.xlane.xlu1 %1613 }
 0x4de   : > { %6791 = vrcp.f32 %v1614_v51  ;;  %v6880_v51 = vmov 1983009808  }
 0x4e1   : > { %v1620_v60 = vpop.xlane.xlu1 %1619 }
 0x4e3   : > { %v6788_v52 = vpop.eup %6787 }
 0x4e4   : > { %v1625_v53 = vmul.f32 %v6788_v52, %v6774_v62  ;;  %v2811_v52 = vunpack.c.l.s4 %v6880_v51 }
 0x4e6   : > { %6580 = vmatpush3.xpose.msk.msra.mxu0 %vm1551_vm4, %v1625_v53  ;;  %v2813_v53 = vlaneseq }
 0x4e7   : > { %v6790_v54 = vpop.eup %6789  ;;  %6589 = vmatprep.subr.mxu0 %v6869_v2 }
 0x4e8   : > { %v1629_v55 = vmul.f32 %v6790_v54, %v7241_v0 }
 0x4e9   : > { %6582 = vmatmul.mubr.msk.f32.vlgmr.msra.gmra.mxu0 %vm1551_vm4, %v7194_v46  ;;  %v1623_v46 = vpop.xlane.xlu0 %1622 }
 0x4ea   : > { %6590 = vmatpush3.xpose.msk.msra.mxu0 %vm1551_vm4, %v1629_v55  ;;  %6591 = vmatprep.mubr.msk.f32.mxu0 %vm6870_vm1, %v6869_v2  ;;  %6793 = vrcp.f32 %v1623_v46  ;;  %v2812_v55 = vunpack.c.0.s8 %v2811_v52 }
 0x4eb   : > { %v6792_v56 = vpop.eup %6791  ;;  %6599 = vmatprep.subr.mxu0 %v6869_v2  ;;  %6795 = vrcp.f32 %v1620_v60 }
 0x4ec   : > { %v1633_v57 = vmul.f32 %v6792_v56, %v7245_v13  ;;  %v2814_v56 = vshrl.u32 %v2813_v53, 7 }
 0x4ed   : > { %6592 = vmatmul.mubr.msk.f32.vlgmr.msra.gmra.mxu0 %vm1551_vm4, %v7217_v11 }
 0x4ee   : > { %6600 = vmatpush3.xpose.msk.msra.mxu0 %vm1551_vm4, %v1633_v57  ;;  %6601 = vmatprep.mubr.msk.f32.mxu0 %vm6870_vm1, %v6869_v2  ;;  %v6881_v57 = vmov 1934713408  }
 0x4ef   : > { %6609 = vmatprep.subr.mxu0 %v6869_v2  ;;  %v2875_v46 = vunpack.c.l.s4 %v6881_v57 }
 0x4f7   : > { %v6794_v61 = vpop.eup %6793 }
 0x4f8   : > { %v6796_v62 = vpop.eup %6795  ;;  %v1639_v13 = vmul.f32 %v6794_v61, %v7224_v49 }
 0x4f9   : > { %v1637_v6 = vmul.f32 %v6796_v62, %v7249_v1  ;;  %v7347_v62 = vsub.s32 %v2812_v55, %v2814_v56 }
 0x50b   : > { %v1864_v63 = vpop.trf.xlu1  ;;  %v1832_v0 = vpop.trf.xlu0 }
 0x50c   : > { %6602 = vmatmul.mubr.msk.f32.vlgmr.msra.gmra.mxu0 %vm1551_vm4, %v1832_v0  ;;  %6607 = vmatmul.mubr.msk.f32.vlgmr.msra.gmra.mxu1 %vm1551_vm4, %v1864_v63 }
 0x50d   : > { %6610 = vmatpush3.xpose.msk.msra.mxu0 %vm1551_vm4, %v1637_v6  ;;  %6615 = vmatpush3.xpose.msk.msra.mxu1 %vm1551_vm4, %v1639_v13  ;;  %v2876_v6 = vunpack.c.0.s8 %v2875_v46 }
 0x50e   : > { %6611 = vmatprep.mubr.msk.f32.mxu0 %vm6870_vm1, %v6869_v2  ;;  %6616 = vmatprep.mubr.msk.f32.mxu1 %vm6870_vm1, %v6869_v2 }
 0x50f   : > { %6619 = vmatprep.subr.mxu0 %v6869_v2 }
 0x513   : > { %v1928_v11 = vpop.trf.xlu1 }
 0x514   : > { %v1896_v38 = vpop.trf.xlu0  ;;  %6617 = vmatmul.mubr.msk.f32.vlgmr.msra.gmra.mxu1 %vm1551_vm4, %v1928_v11 }
 0x515   : > { %6612 = vmatmul.mubr.msk.f32.vlgmr.msra.gmra.mxu0 %vm1551_vm4, %v1896_v38  ;;  %6632 = vmatprep.mubr.msk.f32.mxu1 %vm949_vm3, %v7019_v18 }
 0x516   : > { %6627 = vmatprep.mubr.msk.f32.mxu0 %vm6870_vm1, %v6869_v2 }
 0x52b   : > { %v3206_v49 = vpop.permute.xlu1 %3205 }
 0x52c   : > { %3229 = vxpose.xlu0.b32.start.end [1/1] (short) (narrow) %v3206_v49, 8 }
 0x52f   : > { %v3210_v12 = vpop.permute.xlu1 %3209 }
 0x533   : > { %v7318_v43 = vpop.permute.xlu1 %3211 }
 0x537   : > { %v3208_v1 = vpop.permute.xlu0 %3207 }
 0x538   : > { %3261 = vxpose.xlu1.b32.start.end [1/1] (short) (narrow) %v3208_v1, 8 }
 0x53b   : > { %v7310_v7 = vpop.permute.xlu0 %3215 }
 0x552   : > { %v2092_v47 = vpop.f32.mrf.mxu1 }
 0x554   : > { %v6588_v3 = vpop.f32.mrf.mxu1 }
 0x557   : > { %v2244_v4 = vpop.f32.mrf.mxu1 }
 0x559   : > { %v6598_v5 = vpop.f32.mrf.mxu1 }
 0x5a8   : > { %v3245_v8 = vpop.trf.xlu0 }
 0x5a9   : > { %v2016_v10 = vpop.f32.mrf.mxu0  ;;  %6630 = vmatprep.subr.msk.mxu1 %vm952_vm2, %v3245_v8 }
 0x5aa   : > { %6631 = vmatpush3.msk.msra.mxu1 %vm952_vm2, %v3245_v8  ;;  %2552 = vxpose.xlu0.b32.start.end [1/1] (short) (narrow) %v2016_v10, 8 }
 0x5ab   : > { %v6583_v18 = vpop.f32.mrf.mxu0  ;;  %6633 = vmatmul.mubr.msk.f32.vlgmr.msra.gmra.mxu1 %vm949_vm3, %v7013_v14  ;;  %v643_v14 = vld [vmem:[%s7828_s6 + $0x18] sm:$0xff] }
 0x5ac   : > { %6637 = vmatprep.mubr.msk.f32.mxu1 %vm949_vm3, %v7064_v26  ;;  %v642_v26 = vld [vmem:[%s7828_s6 + $0x10] sm:$0xff]  ;;  %6620 = vmatpush3.msra.mxu0 %v643_v14 }
 0x5ad   : > { %v2168_v16 = vpop.f32.mrf.mxu0  ;;  %6621 = vmatprep.subr.mxu0 %v6869_v2 }
 0x5ae   : > { %2584 = vxpose.xlu0.b32.start.end [1/1] (short) (narrow) %v2092_v47, 8  ;;  %2616 = vxpose.xlu1.b32.start.end [1/1] (short) (narrow) %v2168_v16, 8 }
 0x5af   : > { %v6593_v17 = vpop.f32.mrf.mxu0  ;;  %6622 = vmatpush3.msra.mxu0 %v642_v26 }
 0x5b0   : > { %6623 = vmatprep.subr.mxu0 %v6869_v2 }
 0x5b2   : > { %2648 = vxpose.xlu0.b32.start.end [1/1] (short) (narrow) %v2244_v4, 8  ;;  %v7353_v4 = vsub.s32 %v2876_v6, %v2814_v56 }
 0x5b4   : > { %v3277_v9 = vpop.trf.xlu1 }
 0x5b5   : > { %6635 = vmatprep.subr.msk.mxu1 %vm952_vm2, %v3277_v9 }
 0x5b6   : > { %6636 = vmatpush3.msk.msra.mxu1 %vm952_vm2, %v3277_v9 }
 0x5b7   : > { %6638 = vmatmul.mubr.msk.f32.vlgmr.msra.gmra.mxu1 %vm949_vm3, %v7050_v22  ;;  %v641_v22 = vld [vmem:[%s7828_s6 + $0x8] sm:$0xff] }
 0x5b8   : > { %6647 = vmatprep.mubr.msk.f32.mxu1 %vm949_vm3, %v7068_v27  ;;  %v640_v27 = vld [vmem:[%s7828_s6] sm:$0xff]  ;;  %6624 = vmatpush3.msra.mxu0 %v641_v22 }
 0x5b9   : > { %6625 = vmatprep.subr.mxu0 %v6869_v2 }
 0x5ba   : > { %6626 = vmatpush3.msra.mxu0 %v640_v27 }
 0x5cc   : > { %v2396_v45 = vpop.f32.mrf.mxu1  ;;  %v2320_v48 = vpop.f32.mrf.mxu0 }
 0x5cd   : > { %2712 = vxpose.xlu0.b32.start.end [1/1] (short) (narrow) %v2396_v45, 8  ;;  %2680 = vxpose.xlu1.b32.start.end [1/1] (short) (narrow) %v2320_v48, 8 }
 0x5ce   : > { %v6608_v39 = vpop.f32.mrf.mxu1  ;;  %v6603_v19 = vpop.f32.mrf.mxu0 }
 0x5d1   : > { %3293 = vxpose.xlu0.b32.start.end [1/1] (short) (narrow) %v3210_v12, 8 }
 0x5d4   : > { %v2548_v50 = vpop.f32.mrf.mxu1 }
 0x5d5   : > { %v2472_v59 = vpop.f32.mrf.mxu0  ;;  %2776 = vxpose.xlu0.b32.start.end [1/1] (short) (narrow) %v2548_v50, 8 }
 0x5d6   : > { %2744 = vxpose.xlu1.b32.start.end [1/1] (short) (narrow) %v2472_v59, 8  ;;  %v6618_v44 = vpop.f32.mrf.mxu1 }
 0x5d7   : > { %v6613_v15 = vpop.f32.mrf.mxu0 }
 0x5f4   : > { %3213 = vrot.lane.b32.xlu1 %v7114_v41, %s6878_s22 }
 0x5f8   : > { %3217 = vrot.lane.b32.xlu1 %v7116_v42, %s6878_s22 }
 0x5fe   : > { %3219 = vrot.lane.b32.xlu0 %v7134_v58, %s6878_s22  ;;  %s6887_s22 = smov 28  }
 0x626   : > { %v2568_v54 = vpop.trf.xlu0 }
 0x62a   : > { %v2600_v60 = vpop.trf.xlu0  ;;  %v2632_v61 = vpop.trf.xlu1 }
 0x62b   : > { %v2808_v63 = vcombine.low %v2568_v54, %v2632_v61  ;;  %v2809_v0 = vcombine.high %v2568_v54, %v2632_v61 }
 0x62d   : > { %v2816_v49 = vrot.slane %v2808_v63, %v7347_v62  ;;  %v2823_v1 = vrot.slane %v2809_v0, %v7347_v62 }
 0x62e   : > { %v2664_v13 = vpop.trf.xlu0 }
 0x62f   : > { %v2824_v11 = vcombine.low %v2600_v60, %v2664_v13  ;;  %v2825_v38 = vcombine.high %v2600_v60, %v2664_v13 }
 0x631   : > { %v2832_v47 = vrot.slane %v2824_v11, %v7347_v62  ;;  %v2839_v3 = vrot.slane %v2825_v38, %v7347_v62 }
 0x633   : > { %v2872_v5 = vcombine.low %v2816_v49, %v2832_v47  ;;  %v2873_v8 = vcombine.high %v2816_v49, %v2832_v47  ;;  %v2888_v10 = vcombine.low %v2823_v1, %v2839_v3  ;;  %v2889_v12 = vcombine.high %v2823_v1, %v2839_v3 }
 0x635   : > { %v2880_v18 = vrot.slane %v2872_v5, %v7353_v4  ;;  %v2887_v16 = vrot.slane %v2873_v8, %v7353_v4  ;;  %v2896_v17 = vrot.slane %v2888_v10, %v7353_v4  ;;  %v2903_v9 = vrot.slane %v2889_v12, %v7353_v4 }
 0x637   : > { %v6334_v14 = vcombine.low %v2880_v18, %v2887_v16  ;;  %v6336_v26 = vcombine.high %v2880_v18, %v2887_v16  ;;  %v6338_v22 = vcombine.low %v2896_v17, %v2903_v9  ;;  %v6340_v27 = vcombine.high %v2896_v17, %v2903_v9 }
 0x639   : > { %v2952_v45 = vrot.slane %v6334_v14, %v7347_v62  ;;  %v2968_v48 = vrot.slane %v6336_v26, %v7347_v62  ;;  %v2984_v39 = vrot.slane %v6338_v22, %v7347_v62  ;;  %v3000_v19 = vrot.slane %v6340_v27, %v7347_v62 }
 0x63b   : > { %v3008_v50 = vcombine.low %v2952_v45, %v2968_v48  ;;  %v3040_v59 = vcombine.low %v2984_v39, %v3000_v19  ;;  %v3009_v44 = vcombine.high %v2952_v45, %v2968_v48  ;;  %v3041_v15 = vcombine.high %v2984_v39, %v3000_v19 }
 0x63d   : > { %v7364_v51 = vrot.slane %v3008_v50, %v7353_v4  ;;  %v7367_v52 = vrot.slane %v3040_v59, %v7353_v4  ;;  %v3023_v53 = vrot.slane %v3009_v44, %v7353_v4  ;;  %v3055_v54 = vrot.slane %v3041_v15, %v7353_v4 }
 0x63f   : > { %v3073_v55 = vcombine.high %v7364_v51, %v7367_v52  ;;  %v3074_v56 = vcombine.low %v3023_v53, %v3055_v54  ;;  %v3072_v57 = vcombine.low %v7364_v51, %v7367_v52  ;;  %v3075_v46 = vcombine.high %v3023_v53, %v3055_v54 }
 0x641   : > { %3081 = vrot.lane.b32.xlu1 %v3073_v55, %s6882_s13  ;;  %3085 = vrot.lane.b32.xlu0 %v3074_v56, %s6883_s16 }
 0x645   : > { %3089 = vrot.lane.b32.xlu1 %v3075_v46, %s6884_s19 }
 0x649   : > { %v2728_v60 = vpop.trf.xlu0  ;;  %v2696_v61 = vpop.trf.xlu1 }
 0x64d   : > { %v7378_v63 = vpop.trf.xlu0 }
 0x64e   : > { %6640 = vmatprep.subr.msk.mxu0 %vm952_vm2, %v7378_v63 }
 0x651   : > { %v2792_v0 = vpop.trf.xlu0 }
 0x652   : > { %v2856_v6 = vcombine.low %v2728_v60, %v2792_v0  ;;  %v2857_v13 = vcombine.high %v2728_v60, %v2792_v0  ;;  %v2760_v11 = vpop.trf.xlu1 }
 0x653   : > { %v2840_v38 = vcombine.low %v2696_v61, %v2760_v11  ;;  %v2841_v49 = vcombine.high %v2696_v61, %v2760_v11 }
 0x654   : > { %v2864_v1 = vrot.slane %v2856_v6, %v7347_v62  ;;  %v2871_v47 = vrot.slane %v2857_v13, %v7347_v62 }
 0x655   : > { %v2848_v3 = vrot.slane %v2840_v38, %v7347_v62  ;;  %v2855_v5 = vrot.slane %v2841_v49, %v7347_v62 }
 0x657   : > { %v2904_v8 = vcombine.low %v2848_v3, %v2864_v1  ;;  %v2905_v10 = vcombine.high %v2848_v3, %v2864_v1  ;;  %v2920_v12 = vcombine.low %v2855_v5, %v2871_v47  ;;  %v2921_v18 = vcombine.high %v2855_v5, %v2871_v47 }
 0x659   : > { %v2912_v16 = vrot.slane %v2904_v8, %v7353_v4  ;;  %v2919_v17 = vrot.slane %v2905_v10, %v7353_v4  ;;  %v2928_v9 = vrot.slane %v2920_v12, %v7353_v4  ;;  %v2935_v14 = vrot.slane %v2921_v18, %v7353_v4 }
 0x65b   : > { %v6335_v26 = vcombine.low %v2912_v16, %v2919_v17  ;;  %v6337_v22 = vcombine.high %v2912_v16, %v2919_v17  ;;  %v6339_v27 = vcombine.low %v2928_v9, %v2935_v14  ;;  %v6341_v45 = vcombine.high %v2928_v9, %v2935_v14 }
 0x65d   : > { %v2959_v48 = vrot.slane %v6335_v26, %v7347_v62  ;;  %v2975_v39 = vrot.slane %v6337_v22, %v7347_v62  ;;  %v2991_v19 = vrot.slane %v6339_v27, %v7347_v62  ;;  %v3007_v50 = vrot.slane %v6341_v45, %v7347_v62 }
 0x65f   : > { %v3024_v59 = vcombine.low %v2959_v48, %v2975_v39  ;;  %v3056_v44 = vcombine.low %v2991_v19, %v3007_v50  ;;  %v3025_v15 = vcombine.high %v2959_v48, %v2975_v39  ;;  %v3057_v53 = vcombine.high %v2991_v19, %v3007_v50 }
 0x661   : > { %v3032_v54 = vrot.slane %v3024_v59, %v7353_v4  ;;  %v3064_v55 = vrot.slane %v3056_v44, %v7353_v4  ;;  %v3039_v60 = vrot.slane %v3025_v15, %v7353_v4  ;;  %v3071_v61 = vrot.slane %v3057_v53, %v7353_v4 }
 0x663   : > { %v3077_v56 = vcombine.high %v3032_v54, %v3064_v55  ;;  %v3076_v46 = vcombine.low %v3032_v54, %v3064_v55  ;;  %v3079_v0 = vcombine.high %v3039_v60, %v3071_v61  ;;  %v3078_v6 = vcombine.low %v3039_v60, %v3071_v61 }
 0x665   : > { %3097 = vrot.lane.b32.xlu1 %v3077_v56, %s6885_s20  ;;  %3093 = vrot.lane.b32.xlu0 %v3076_v46, %s6886_s21 }
 0x666   : > { %v3214_v13 = vpop.permute.xlu1 %3213 }
 0x669   : > { %3105 = vrot.lane.b32.xlu1 %v3079_v0, %s6887_s22  ;;  %3101 = vrot.lane.b32.xlu0 %v3078_v6, %s6888_s24 }
 0x66a   : > { %v3218_v11 = vpop.permute.xlu1 %3217 }
 0x66b   : > { %v7404_v49 = vpop.f32.mrf.mxu1 }
 0x66c   : > { %v4144_v3 = vsel %vm3109_vm5, %v7404_v49, -inf }
 0x66d   : > { %v7406_v1 = vpop.f32.mrf.mxu1 }
 0x66e   : > { %v4141_v8 = vsel %vm3109_vm5, %v7406_v1, -inf }
 0x670   : > { %v3220_v38 = vpop.permute.xlu0 %3219 }
 0x677   : > { %v7408_v47 = vpop.f32.mrf.mxu1 }
 0x679   : > { %v7412_v5 = vpop.f32.mrf.mxu1 }
 0x687   : > { %3325 = vxpose.xlu0.b32.start.end [1/1] (short) (narrow) %v7318_v43, 8  ;;  %v4150_v43 = vsel %vm3109_vm5, %v7408_v47, -inf }
 0x68b   : > { %3357 = vxpose.xlu0.b32.start.end [1/1] (short) (narrow) %v3214_v13, 8 }
 0x68f   : > { %3421 = vxpose.xlu0.b32.start.end [1/1] (short) (narrow) %v3218_v11, 8 }
 0x692   : > { %3389 = vxpose.xlu1.b32.start.end [1/1] (short) (narrow) %v7310_v7, 8  ;;  %v4147_v7 = vsel %vm3109_vm5, %v7412_v5, -inf }
 0x696   : > { %3453 = vxpose.xlu1.b32.start.end [1/1] (short) (narrow) %v3220_v38, 8 }
 0x6b3   : > { %v3082_v10 = vpop.permute.xlu1 %3081  ;;  %v3086_v18 = vpop.permute.xlu0 %3085 }
 0x6b4   : > { %v3108_v12 = vsel %vm949_vm3, %v3072_v57, %v3082_v10 }
 0x6b5   : > { %v3110_v17 = vsel %vm3109_vm5, %v3108_v12, %v3086_v18 }
 0x6b7   : > { %v3090_v16 = vpop.permute.xlu1 %3089 }
 0x6b8   : > { %v3112_v9 = vsel %vm3111_vm6, %v3110_v17, %v3090_v16 }
 0x6bc   : > { %4145 = vmax.xlane.f32.xlu0 %v4144_v3 }
 0x6bd   : > { %4151 = vmax.xlane.f32.xlu1 %v4150_v43 }
 0x6c0   : > { %4148 = vmax.xlane.f32.xlu0 %v4147_v7 }
 0x6c1   : > { %4142 = vmax.xlane.f32.xlu1 %v4141_v8 }
 0x6d2   : > { %4317 = vrot.lane.b32.xlu1 %v7036_v20, %s6879_s23 }
 0x6d7   : > { %v3094_v14 = vpop.permute.xlu0 %3093  ;;  %v3098_v26 = vpop.permute.xlu1 %3097 }
 0x6d8   : > { %v3113_v22 = vsel %vm1551_vm4, %v3112_v9, %v3094_v14 }
 0x6d9   : > { %v3115_v20 = vsel %vm3114_vm7, %v3113_v22, %v3098_v26 }
 0x6db   : > { %v3102_v27 = vpop.permute.xlu0 %3101  ;;  %v3106_v51 = vpop.permute.xlu1 %3105 }
 0x6dc   : > { %v3117_v52 = vsel %vm3116_vm8, %v3115_v20, %v3102_v27 }
 0x6dd   : > { %v3119_v57 = vsel %vm3118_vm9, %v3117_v52, %v3106_v51 }
 0x6de   : > { %6628 = vmatmul.mubr.msk.f32.vlgmr.msra.gmra.mxu0 %vm429_vm0, %v3119_v57 }
 0x6df   : > { %6641 = vmatpush3.msk.msra.mxu0 %vm952_vm2, %v7378_v63  ;;  %6642 = vmatprep.mubr.msk.f32.mxu0 %vm949_vm3, %v7062_v25 }
 0x6e2   : > { %6643 = vmatmul.mubr.msk.f32.vlgmr.msra.gmra.mxu0 %vm949_vm3, %v7056_v24 }
 0x6e3   : > { %6652 = vmatprep.mubr.msk.f32.mxu0 %vm949_vm3, %v7076_v30 }
 0x703   : > { %v3341_v45 = vpop.trf.xlu0 }
 0x704   : > { %6645 = vmatprep.subr.msk.mxu1 %vm952_vm2, %v3341_v45 }
 0x705   : > { %6646 = vmatpush3.msk.msra.mxu1 %vm952_vm2, %v3341_v45 }
 0x706   : > { %6648 = vmatmul.mubr.msk.f32.vlgmr.msra.gmra.mxu1 %vm949_vm3, %v7048_v21 }
 0x707   : > { %6657 = vmatprep.mubr.msk.f32.mxu1 %vm949_vm3, %v7074_v29  ;;  %v3373_v63 = vpop.trf.xlu0 }
 0x708   : > { %6650 = vmatprep.subr.msk.mxu0 %vm952_vm2, %v3373_v63 }
 0x709   : > { %6651 = vmatpush3.msk.msra.mxu0 %vm952_vm2, %v3373_v63 }
 0x70a   : > { %6653 = vmatmul.mubr.msk.f32.vlgmr.msra.gmra.mxu0 %vm949_vm3, %v7070_v28 }
 0x70b   : > { %v3437_v24 = vpop.trf.xlu0  ;;  %6662 = vmatprep.mubr.msk.f32.mxu0 %vm949_vm3, %v7080_v32 }
 0x70c   : > { %6660 = vmatprep.subr.msk.mxu0 %vm952_vm2, %v3437_v24 }
 0x70d   : > { %6661 = vmatpush3.msk.msra.mxu0 %vm952_vm2, %v3437_v24 }
 0x70e   : > { %6663 = vmatmul.mubr.msk.f32.vlgmr.msra.gmra.mxu0 %vm949_vm3, %v7084_v34  ;;  %v3405_v21 = vpop.trf.xlu1  ;;  %6670 = vmatprep.subr.mxu0 %v6869_v2 }
 0x70f   : > { %6655 = vmatprep.subr.msk.mxu1 %vm952_vm2, %v3405_v21  ;;  %6674 = vmatprep.mubr.msk.f32.mxu0 %vm6870_vm1, %v6869_v2 }
 0x710   : > { %6656 = vmatpush3.msk.msra.mxu1 %vm952_vm2, %v3405_v21 }
 0x711   : > { %6658 = vmatmul.mubr.msk.f32.vlgmr.msra.gmra.mxu1 %vm949_vm3, %v7054_v23 }
 0x712   : > { %6667 = vmatprep.mubr.msk.f32.mxu1 %vm949_vm3, %v7078_v31  ;;  %v3469_v25 = vpop.trf.xlu1 }
 0x713   : > { %6665 = vmatprep.subr.msk.mxu1 %vm952_vm2, %v3469_v25 }
 0x714   : > { %6666 = vmatpush3.msk.msra.mxu1 %vm952_vm2, %v3469_v25 }
 0x715   : > { %6668 = vmatmul.mubr.msk.f32.vlgmr.msra.gmra.mxu1 %vm949_vm3, %v7082_v33  ;;  %6677 = vmatprep.subr.mxu1 %v6869_v2 }
 0x716   : > { %6681 = vmatprep.mubr.msk.f32.mxu1 %vm6870_vm1, %v6869_v2 }
 0x745   : > { %v4146_v30 = vpop.xlane.xlu0 %4145 }
 0x746   : > { %v7473_v28 = vpop.xlane.xlu1 %4151  ;;  %v4190_v31 = vsub.f32 %v7404_v49, %v4146_v30 }
 0x747   : > { %v4192_v30 = vsub.f32 %v7408_v47, %v7473_v28 }
 0x748   : > { %v4207_v32 = vmul.f32 1.442695, %v4190_v31 }
 0x749   : > { %v4211_v31 = vmul.f32 1.442695, %v4192_v30 }
 0x74a   : > { %v4143_v29 = vpop.xlane.xlu1 %4142  ;;  %6797 = vpow2.f32 %v4207_v32 }
 0x74b   : > { %v4189_v33 = vsub.f32 %v7406_v1, %v4143_v29 }
 0x74d   : > { %v4205_v34 = vmul.f32 1.442695, %v4189_v33 }
 0x74e   : > { %v4318_v23 = vpop.permute.xlu1 %4317 }
 0x74f   : > { %4341 = vxpose.xlu1.b32.start.end [1/1] (short) (narrow) %v4318_v23, 8  ;;  %6799 = vpow2.f32 %v4205_v34 }
 0x757   : > { %v6798_v48 = vpop.eup %6797 }
 0x758   : > { %v4240_v39 = vsel %vm3109_vm5, %v6798_v48, 0.0 }
 0x75c   : > { %v6800_v19 = vpop.eup %6799 }
 0x75d   : > { %v4237_v50 = vsel %vm3109_vm5, %v6800_v19, 0.0 }
 0x76d   : > { %4321 = vrot.lane.b32.xlu1 %v7112_v40, %s6879_s23  ;;  %v6342_v40 = vld [vmem:[%s7829_s7] ss:$0 sm:$0xff] }
 0x791   : > { %4241 = vadd.xlane.f32.xlu1 %v4240_v39 }
 0x795   : > { %4238 = vadd.xlane.f32.xlu1 %v4237_v50 }
 0x79e   : > { %v3195_v59 = vpop.f32.mrf.mxu0 }
 0x79f   : > { %v3196_v44 = vadd.f32 %v6342_v40, %v3195_v59 }
 0x7a0   : > { %v6629_v15 = vpop.f32.mrf.mxu0 }
 0x7a1   : > { %3199 = vst.msk [vmem:[%s409_s29] sm:$0xff] %vm429_vm0, %v3196_v44 }
 0x7a2   : > { %v7490_v53 = vpop.f32.mrf.mxu0 }
 0x7a3   : > { %v4156_v54 = vsel %vm3109_vm5, %v7490_v53, -inf }
 0x7a4   : > { %4157 = vmax.xlane.f32.xlu1 %v4156_v54  ;;  %v7494_v55 = vpop.f32.mrf.mxu0 }
 0x7a5   : > { %v4153_v56 = vsel %vm3109_vm5, %v7494_v55, -inf }
 0x7a8   : > { %4154 = vmax.xlane.f32.xlu1 %v4153_v56 }
 0x7c6   : > { %v7498_v46 = vpop.f32.mrf.mxu1 }
 0x7c7   : > { %v4162_v60 = vsel %vm3109_vm5, %v7498_v46, -inf }
 0x7c8   : > { %v7502_v61 = vpop.f32.mrf.mxu1  ;;  %4163 = vmax.xlane.f32.xlu0 %v4162_v60 }
 0x7c9   : > { %v4159_v6 = vsel %vm3109_vm5, %v7502_v61, -inf }
 0x7ca   : > { %v7504_v0 = vpop.f32.mrf.mxu0 }
 0x7cb   : > { %v4168_v13 = vsel %vm3109_vm5, %v7504_v0, -inf  ;;  %v4357_v14 = vpop.trf.xlu1 }
 0x7cc   : > { %4160 = vmax.xlane.f32.xlu0 %v4159_v6  ;;  %4169 = vmax.xlane.f32.xlu1 %v4168_v13  ;;  %v7510_v11 = vpop.f32.mrf.mxu0 }
 0x7cd   : > { %v4165_v38 = vsel %vm3109_vm5, %v7510_v11, -inf }
 0x7ce   : > { %v7514_v49 = vpop.f32.mrf.mxu0 }
 0x7cf   : > { %v4180_v7 = vsel %vm3109_vm5, %v7514_v49, -inf }
 0x7d0   : > { %4166 = vmax.xlane.f32.xlu1 %v4165_v38  ;;  %v7519_v8 = vpop.f32.mrf.mxu0 }
 0x7d1   : > { %v6659_v1 = vpop.f32.mrf.mxu1  ;;  %v4177_v18 = vsel %vm3109_vm5, %v7519_v8, -inf }
 0x7d2   : > { %v4174_v3 = vsel %vm3109_vm5, %v6659_v1, -inf }
 0x7d3   : > { %4175 = vmax.xlane.f32.xlu0 %v4174_v3  ;;  %v3968_v43 = vpop.f32.mrf.mxu1 }
 0x7d4   : > { %4181 = vmax.xlane.f32.xlu1 %v4180_v7  ;;  %v4171_v10 = vsel %vm3109_vm5, %v3968_v43, -inf }
 0x7d5   : > { %v6669_v12 = vpop.f32.mrf.mxu1 }
 0x7d6   : > { %v4186_v16 = vsel %vm3109_vm5, %v6669_v12, -inf }
 0x7d7   : > { %4172 = vmax.xlane.f32.xlu0 %v4171_v10  ;;  %v4132_v17 = vpop.f32.mrf.mxu1 }
 0x7d8   : > { %4178 = vmax.xlane.f32.xlu1 %v4177_v18  ;;  %v4183_v9 = vsel %vm3109_vm5, %v4132_v17, -inf }
 0x7db   : > { %4187 = vmax.xlane.f32.xlu0 %v4186_v16 }
 0x7df   : > { %4184 = vmax.xlane.f32.xlu0 %v4183_v9  ;;  %v7528_v26 = vpop.permute.xlu1 %4321 }
 0x7f5   : > { %4319 = vrot.lane.b32.xlu0 %v7106_v35, %s6879_s23  ;;  %v4149_v35 = vpop.xlane.xlu0 %4148 }
 0x7f6   : > { %v4191_v32 = vsub.f32 %v7412_v5, %v4149_v35 }
 0x7f8   : > { %v4209_v33 = vmul.f32 1.442695, %v4191_v32 }
 0x81a   : > { %v4242_v22 = vpop.xlane.xlu1 %4241 }
 0x81b   : > { %6801 = vrcp.f32 %v4242_v22 }
 0x81e   : > { %v4239_v20 = vpop.xlane.xlu1 %4238 }
 0x81f   : > { %6803 = vrcp.f32 %v4239_v20 }
 0x820   : > { %6805 = vpow2.f32 %v4211_v31 }
 0x821   : > { %6807 = vpow2.f32 %v4209_v33 }
 0x828   : > { %v6802_v27 = vpop.eup %6801 }
 0x829   : > { %v4288_v51 = vmul.f32 %v6802_v27, %v6798_v48 }
 0x82b   : > { %6671 = vmatpush3.xpose.msk.msra.mxu0 %vm3109_vm5, %v4288_v51 }
 0x82c   : > { %v6804_v52 = vpop.eup %6803  ;;  %6672 = vmatprep.subr.mxu0 %v6869_v2 }
 0x82d   : > { %v4286_v57 = vmul.f32 %v6804_v52, %v6800_v19  ;;  %v7548_v50 = vpop.eup %6805  ;;  %v4158_v16 = vpop.xlane.xlu1 %4157 }
 0x82e   : > { %v4246_v5 = vsel %vm3109_vm5, %v7548_v50, 0.0  ;;  %v7552_v40 = vpop.eup %6807 }
 0x82f   : > { %6673 = vmatpush3.xpose.msk.msra.mxu0 %vm3109_vm5, %v4286_v57  ;;  %v4243_v15 = vsel %vm3109_vm5, %v7552_v40, 0.0 }
 0x830   : > { %6684 = vmatprep.subr.mxu0 %v6869_v2 }
 0x832   : > { %6675 = vmatmul.mubr.msk.f32.vlgmr.msra.gmra.mxu0 %vm3109_vm5, %v4357_v14  ;;  %v4194_v14 = vsub.f32 %v7490_v53, %v4158_v16 }
 0x833   : > { %6688 = vmatprep.mubr.msk.f32.mxu0 %vm6870_vm1, %v6869_v2 }
 0x834   : > { %v4215_v22 = vmul.f32 1.442695, %v4194_v14 }
 0x851   : > { %v4164_v45 = vpop.xlane.xlu0 %4163 }
 0x852   : > { %v4196_v34 = vsub.f32 %v7498_v46, %v4164_v45 }
 0x854   : > { %v4219_v48 = vmul.f32 1.442695, %v4196_v34 }
 0x855   : > { %v4161_v63 = vpop.xlane.xlu0 %4160 }
 0x856   : > { %6809 = vpow2.f32 %v4219_v48 }
 0x85c   : > { %v4176_v24 = vpop.xlane.xlu0 %4175 }
 0x860   : > { %v4173_v21 = vpop.xlane.xlu0 %4172 }
 0x863   : > { %v7556_v54 = vpop.eup %6809 }
 0x864   : > { %v4188_v25 = vpop.xlane.xlu0 %4187  ;;  %v4258_v46 = vsel %vm3109_vm5, %v7556_v54, 0.0 }
 0x865   : > { %v4204_v28 = vsub.f32 %v6669_v12, %v4188_v25 }
 0x867   : > { %v4235_v59 = vmul.f32 1.442695, %v4204_v28 }
 0x868   : > { %v4185_v29 = vpop.xlane.xlu0 %4184 }
 0x869   : > { %v4203_v44 = vsub.f32 %v4132_v17, %v4185_v29  ;;  %v4155_v17 = vpop.xlane.xlu1 %4154 }
 0x86a   : > { %v4193_v20 = vsub.f32 %v7494_v55, %v4155_v17 }
 0x86b   : > { %v4233_v56 = vmul.f32 1.442695, %v4203_v44 }
 0x86c   : > { %v4320_v23 = vpop.permute.xlu0 %4319 }
 0x86d   : > { %4373 = vxpose.xlu0.b32.start.end [1/1] (short) (narrow) %v4320_v23, 8  ;;  %v4170_v9 = vpop.xlane.xlu1 %4169 }
 0x86e   : > { %v4198_v52 = vsub.f32 %v7504_v0, %v4170_v9 }
 0x871   : > { %v4167_v27 = vpop.xlane.xlu1 %4166 }
 0x872   : > { %v4197_v35 = vsub.f32 %v7510_v11, %v4167_v27 }
 0x874   : > { %v4221_v45 = vmul.f32 1.442695, %v4197_v35 }
 0x875   : > { %v4182_v57 = vpop.xlane.xlu1 %4181 }
 0x876   : > { %v4202_v53 = vsub.f32 %v7514_v49, %v4182_v57 }
 0x879   : > { %v4179_v55 = vpop.xlane.xlu1 %4178 }
 0x896   : > { %4323 = vrot.lane.b32.xlu0 %v7108_v36, %s6879_s23  ;;  %v4195_v36 = vsub.f32 %v7502_v61, %v4161_v63 }
 0x898   : > { %v4217_v39 = vmul.f32 1.442695, %v4195_v36 }
 0x89a   : > { %4327 = vrot.lane.b32.xlu0 %v7110_v37, %s6879_s23  ;;  %v4200_v37 = vsub.f32 %v6659_v1, %v4176_v24  ;;  %6811 = vpow2.f32 %v4217_v39  ;;  %v4231_v24 = vmul.f32 1.442695, %v4202_v53 }
 0x89c   : > { %v4227_v19 = vmul.f32 1.442695, %v4200_v37 }
 0x89e   : > { %4331 = vrot.lane.b32.xlu0 %v7134_v58, %s6879_s23  ;;  %v4199_v58 = vsub.f32 %v3968_v43, %v4173_v21  ;;  %6813 = vpow2.f32 %v4227_v19  ;;  %v4201_v21 = vsub.f32 %v7519_v8, %v4179_v55 }
 0x8a0   : > { %v4225_v47 = vmul.f32 1.442695, %v4199_v58  ;;  %v4229_v29 = vmul.f32 1.442695, %v4201_v21 }
 0x8a2   : > { %6815 = vpow2.f32 %v4225_v47 }
 0x8a3   : > { %6817 = vpow2.f32 %v4235_v59 }
 0x8a4   : > { %6819 = vpow2.f32 %v4233_v56 }
 0x8a5   : > { %6821 = vpow2.f32 %v4215_v22 }
 0x8a7   : > { %v7560_v60 = vpop.eup %6811 }
 0x8a8   : > { %v4255_v61 = vsel %vm3109_vm5, %v7560_v60, 0.0 }
 0x8ab   : > { %v7564_v6 = vpop.eup %6813 }
 0x8ac   : > { %v4270_v13 = vsel %vm3109_vm5, %v7564_v6, 0.0 }
 0x8af   : > { %v7568_v38 = vpop.eup %6815 }
 0x8b0   : > { %v4267_v1 = vsel %vm3109_vm5, %v7568_v38, 0.0  ;;  %v7572_v3 = vpop.eup %6817 }
 0x8b1   : > { %v4282_v43 = vsel %vm3109_vm5, %v7572_v3, 0.0  ;;  %v7576_v7 = vpop.eup %6819 }
 0x8b2   : > { %v4279_v10 = vsel %vm3109_vm5, %v7576_v7, 0.0  ;;  %v7597_v0 = vpop.eup %6821 }
 0x8b3   : > { %v4252_v23 = vsel %vm3109_vm5, %v7597_v0, 0.0 }
 0x8bd   : > { %4247 = vadd.xlane.f32.xlu0 %v4246_v5 }
 0x8c1   : > { %4244 = vadd.xlane.f32.xlu0 %v4243_v15 }
 0x8c5   : > { %4259 = vadd.xlane.f32.xlu0 %v4258_v46 }
 0x8c9   : > { %4256 = vadd.xlane.f32.xlu0 %v4255_v61 }
 0x8cd   : > { %4271 = vadd.xlane.f32.xlu0 %v4270_v13 }
 0x8d1   : > { %4268 = vadd.xlane.f32.xlu0 %v4267_v1 }
 0x8d5   : > { %4283 = vadd.xlane.f32.xlu0 %v4282_v43 }
 0x8d9   : > { %4280 = vadd.xlane.f32.xlu0 %v4279_v10 }
 0x8e9   : > { %v7580_v12 = vpop.trf.xlu0 }
 0x8f2   : > { %v4672_v44 = vpop.f32.mrf.mxu0 }
 0x906   : > { %4405 = vxpose.xlu0.b32.start.end [1/1] (short) (narrow) %v7528_v26, 8  ;;  %v4213_v26 = vmul.f32 1.442695, %v4193_v20 }
 0x908   : > { %v4324_v18 = vpop.permute.xlu0 %4323  ;;  %6823 = vpow2.f32 %v4213_v26 }
 0x909   : > { %4437 = vxpose.xlu1.b32.start.end [1/1] (short) (narrow) %v4324_v18, 8 }
 0x90c   : > { %v7589_v51 = vpop.permute.xlu0 %4327 }
 0x915   : > { %v7601_v30 = vpop.eup %6823 }
 0x916   : > { %v4249_v31 = vsel %vm3109_vm5, %v7601_v30, 0.0 }
 0x927   : > { %4325 = vrot.lane.b32.xlu1 %v7114_v41, %s6879_s23  ;;  %v4223_v41 = vmul.f32 1.442695, %v4198_v52 }
 0x929   : > { %6825 = vpow2.f32 %v4223_v41 }
 0x92b   : > { %4329 = vrot.lane.b32.xlu1 %v7116_v42, %s6879_s23  ;;  %v7593_v42 = vpop.permute.xlu0 %4331 }
 0x936   : > { %v7605_v8 = vpop.eup %6825 }
 0x937   : > { %v4264_v34 = vsel %vm3109_vm5, %v7605_v8, 0.0 }
 0x946   : > { %v4248_v63 = vpop.xlane.xlu0 %4247 }
 0x947   : > { %6827 = vrcp.f32 %v4248_v63 }
 0x948   : > { %6829 = vpow2.f32 %v4221_v45 }
 0x94a   : > { %v4245_v25 = vpop.xlane.xlu0 %4244 }
 0x94b   : > { %6831 = vrcp.f32 %v4245_v25 }
 0x94c   : > { %6833 = vpow2.f32 %v4231_v24 }
 0x94e   : > { %v4260_v11 = vpop.xlane.xlu0 %4259 }
 0x94f   : > { %6835 = vrcp.f32 %v4260_v11  ;;  %4253 = vadd.xlane.f32.xlu1 %v4252_v23 }
 0x950   : > { %6837 = vpow2.f32 %v4229_v29 }
 0x952   : > { %v4257_v49 = vpop.xlane.xlu0 %4256 }
 0x953   : > { %6839 = vrcp.f32 %v4257_v49  ;;  %4250 = vadd.xlane.f32.xlu1 %v4249_v31 }
 0x954   : > { %v6828_v32 = vpop.eup %6827 }
 0x955   : > { %v4292_v33 = vmul.f32 %v6828_v32, %v7548_v50  ;;  %v7610_v48 = vpop.eup %6829 }
 0x956   : > { %v4261_v37 = vsel %vm3109_vm5, %v7610_v48, 0.0  ;;  %v4272_v15 = vpop.xlane.xlu0 %4271 }
 0x957   : > { %6678 = vmatpush3.xpose.msk.msra.mxu1 %vm3109_vm5, %v4292_v33  ;;  %4265 = vadd.xlane.f32.xlu1 %v4264_v34  ;;  %6841 = vrcp.f32 %v4272_v15 }
 0x958   : > { %v6832_v36 = vpop.eup %6831  ;;  %6679 = vmatprep.subr.mxu1 %v6869_v2 }
 0x959   : > { %v4290_v39 = vmul.f32 %v6832_v36, %v7552_v40  ;;  %v7617_v19 = vpop.eup %6833 }
 0x95a   : > { %v4276_v47 = vsel %vm3109_vm5, %v7617_v19, 0.0  ;;  %v4269_v56 = vpop.xlane.xlu0 %4268 }
 0x95b   : > { %6680 = vmatpush3.xpose.msk.msra.mxu1 %vm3109_vm5, %v4290_v39  ;;  %4262 = vadd.xlane.f32.xlu1 %v4261_v37  ;;  %6843 = vrcp.f32 %v4269_v56 }
 0x95c   : > { %v6836_v58 = vpop.eup %6835  ;;  %6691 = vmatprep.subr.mxu1 %v6869_v2 }
 0x95d   : > { %v4300_v50 = vmul.f32 %v6836_v58, %v7556_v54  ;;  %v7626_v28 = vpop.eup %6837  ;;  %v6676_v54 = vpop.f32.mrf.mxu0 }
 0x95e   : > { %6682 = vmatmul.mubr.msk.f32.vlgmr.msra.gmra.mxu1 %vm3109_vm5, %v7580_v12  ;;  %v4273_v59 = vsel %vm3109_vm5, %v7626_v28, 0.0 }
 0x95f   : > { %6692 = vmatpush3.xpose.msk.msra.mxu1 %vm3109_vm5, %v4300_v50  ;;  %4277 = vadd.xlane.f32.xlu1 %v4276_v47 }
 0x960   : > { %v6840_v5 = vpop.eup %6839  ;;  %6693 = vmatprep.subr.mxu1 %v6869_v2  ;;  %6695 = vmatprep.mubr.msk.f32.mxu1 %vm6870_vm1, %v6869_v2 }
 0x961   : > { %v4298_v40 = vmul.f32 %v6840_v5, %v7560_v60 }
 0x963   : > { %6694 = vmatpush3.xpose.msk.msra.mxu1 %vm3109_vm5, %v4298_v40  ;;  %4274 = vadd.xlane.f32.xlu1 %v4273_v59 }
 0x964   : > { %6705 = vmatprep.subr.mxu1 %v6869_v2  ;;  %v6842_v46 = vpop.eup %6841 }
 0x965   : > { %v4308_v13 = vmul.f32 %v6842_v46, %v7564_v6 }
 0x968   : > { %v6844_v1 = vpop.eup %6843 }
 0x969   : > { %v4306_v60 = vmul.f32 %v6844_v1, %v7568_v38  ;;  %v4284_v38 = vpop.xlane.xlu0 %4283 }
 0x96d   : > { %v4281_v14 = vpop.xlane.xlu0 %4280 }
 0x982   : > { %v4421_v27 = vpop.trf.xlu0 }
 0x985   : > { %v4453_v61 = vpop.trf.xlu1 }
 0x986   : > { %6696 = vmatmul.mubr.msk.f32.vlgmr.msra.gmra.mxu1 %vm3109_vm5, %v4453_v61 }
 0x987   : > { %6706 = vmatpush3.xpose.msk.msra.mxu1 %vm3109_vm5, %v4308_v13  ;;  %6709 = vmatprep.mubr.msk.f32.mxu1 %vm6870_vm1, %v6869_v2 }
 0x988   : > { %6707 = vmatprep.subr.mxu1 %v6869_v2 }
 0x98b   : > { %6708 = vmatpush3.xpose.msk.msra.mxu1 %vm3109_vm5, %v4306_v60 }
 0x98c   : > { %6719 = vmatprep.subr.mxu1 %v6869_v2 }
 0x996   : > { %4501 = vxpose.xlu1.b32.start.end [1/1] (short) (narrow) %v7589_v51, 8 }
 0x999   : > { %v4326_v43 = vpop.permute.xlu1 %4325 }
 0x99a   : > { %4565 = vxpose.xlu1.b32.start.end [1/1] (short) (narrow) %v7593_v42, 8  ;;  %4469 = vxpose.xlu0.b32.start.end [1/1] (short) (narrow) %v4326_v43, 8 }
 0x99d   : > { %v4330_v6 = vpop.permute.xlu1 %4329 }
 0x99e   : > { %4533 = vxpose.xlu0.b32.start.end [1/1] (short) (narrow) %v4330_v6, 8 }
 0x9a2   : > { %5229 = vxpose.xlu0.b32.start.end [1/1] (short) (narrow) %v4672_v44, 16 }
 0x9d8   : > { %v4254_v10 = vpop.xlane.xlu1 %4253 }
 0x9d9   : > { %6845 = vrcp.f32 %v4254_v10 }
 0x9dc   : > { %v4251_v12 = vpop.xlane.xlu1 %4250 }
 0x9dd   : > { %6847 = vrcp.f32 %v4251_v12 }
 0x9e0   : > { %v4266_v18 = vpop.xlane.xlu1 %4265 }
 0x9e1   : > { %6849 = vrcp.f32 %v4266_v18 }
 0x9e4   : > { %v4263_v16 = vpop.xlane.xlu1 %4262 }
 0x9e5   : > { %6851 = vrcp.f32 %v4263_v16 }
 0x9e6   : > { %v6846_v17 = vpop.eup %6845  ;;  %6853 = vrcp.f32 %v4284_v38 }
 0x9e7   : > { %v4296_v9 = vmul.f32 %v6846_v17, %v7597_v0  ;;  %6855 = vrcp.f32 %v4281_v14 }
 0x9e8   : > { %v4278_v41 = vpop.xlane.xlu1 %4277 }
 0x9e9   : > { %6685 = vmatpush3.xpose.msk.msra.mxu0 %vm3109_vm5, %v4296_v9  ;;  %6857 = vrcp.f32 %v4278_v41 }
 0x9ea   : > { %v6848_v22 = vpop.eup %6847  ;;  %6686 = vmatprep.subr.mxu0 %v6869_v2 }
 0x9eb   : > { %v4294_v20 = vmul.f32 %v6848_v22, %v7601_v30 }
 0x9ec   : > { %v4275_v35 = vpop.xlane.xlu1 %4274 }
 0x9ed   : > { %6687 = vmatpush3.xpose.msk.msra.mxu0 %vm3109_vm5, %v4294_v20  ;;  %6859 = vrcp.f32 %v4275_v35 }
 0x9ee   : > { %v6850_v51 = vpop.eup %6849  ;;  %6698 = vmatprep.subr.mxu0 %v6869_v2 }
 0x9ef   : > { %v4304_v26 = vmul.f32 %v6850_v51, %v7605_v8 }
 0x9f0   : > { %6689 = vmatmul.mubr.msk.f32.vlgmr.msra.gmra.mxu0 %vm3109_vm5, %v4421_v27 }
 0x9f1   : > { %6699 = vmatpush3.xpose.msk.msra.mxu0 %vm3109_vm5, %v4304_v26  ;;  %6702 = vmatprep.mubr.msk.f32.mxu0 %vm6870_vm1, %v6869_v2 }
 0x9f2   : > { %v6852_v52 = vpop.eup %6851  ;;  %6700 = vmatprep.subr.mxu0 %v6869_v2 }
 0x9f3   : > { %v4302_v57 = vmul.f32 %v6852_v52, %v7610_v48  ;;  %v6854_v42 = vpop.eup %6853 }
 0x9f4   : > { %v6856_v45 = vpop.eup %6855  ;;  %v4316_v63 = vmul.f32 %v6854_v42, %v7572_v3 }
 0x9f5   : > { %6701 = vmatpush3.xpose.msk.msra.mxu0 %vm3109_vm5, %v4302_v57  ;;  %v4314_v25 = vmul.f32 %v6856_v45, %v7576_v7 }
 0x9f6   : > { %6712 = vmatprep.subr.mxu0 %v6869_v2  ;;  %v6858_v55 = vpop.eup %6857 }
 0x9f7   : > { %v4312_v21 = vmul.f32 %v6858_v55, %v7617_v19 }
 0x9fa   : > { %v6860_v0 = vpop.eup %6859 }
 0x9fb   : > { %v4310_v29 = vmul.f32 %v6860_v0, %v7626_v28 }
 0xa12   : > { %v4517_v53 = vpop.trf.xlu1 }
 0xa13   : > { %6710 = vmatmul.mubr.msk.f32.vlgmr.msra.gmra.mxu1 %vm3109_vm5, %v4517_v53 }
 0xa14   : > { %6720 = vmatpush3.xpose.msk.msra.mxu1 %vm3109_vm5, %v4316_v63  ;;  %6723 = vmatprep.mubr.msk.f32.mxu1 %vm6870_vm1, %v6869_v2 }
 0xa15   : > { %6721 = vmatprep.subr.mxu1 %v6869_v2 }
 0xa16   : > { %v4485_v24 = vpop.trf.xlu0  ;;  %v4581_v3 = vpop.trf.xlu1 }
 0xa17   : > { %6703 = vmatmul.mubr.msk.f32.vlgmr.msra.gmra.mxu0 %vm3109_vm5, %v4485_v24 }
 0xa18   : > { %6713 = vmatpush3.xpose.msk.msra.mxu0 %vm3109_vm5, %v4312_v21  ;;  %6722 = vmatpush3.xpose.msk.msra.mxu1 %vm3109_vm5, %v4314_v25 }
 0xa19   : > { %6714 = vmatprep.subr.mxu0 %v6869_v2  ;;  %6716 = vmatprep.mubr.msk.f32.mxu0 %vm6870_vm1, %v6869_v2 }
 0xa1a   : > { %v4549_v7 = vpop.trf.xlu0 }
 0xa1b   : > { %6724 = vmatmul.mubr.msk.f32.vlgmr.msra.gmra.mxu1 %vm3109_vm5, %v4581_v3 }
 0xa1c   : > { %6715 = vmatpush3.xpose.msk.msra.mxu0 %vm3109_vm5, %v4310_v29 }
 0xa1e   : > { %v4751_v11 = vpop.f32.mrf.mxu1  ;;  %v5245_v50 = vpop.trf.xlu0 }
 0xa1f   : > { %5261 = vxpose.xlu1.b32.start.end [1/1] (short) (narrow) %v4751_v11, 16  ;;  %6717 = vmatmul.mubr.msk.f32.vlgmr.msra.gmra.mxu0 %vm3109_vm5, %v4549_v7 }
 0xa20   : > { %v6683_v23 = vpop.f32.mrf.mxu1 }
 0xa22   : > { %v5246_v28 = vpop.trf.xlu0 }
 0xa46   : > { %v4909_v30 = vpop.f32.mrf.mxu1 }
 0xa47   : > { %5325 = vxpose.xlu1.b32.start.end [1/1] (short) (narrow) %v4909_v30, 16 }
 0xa48   : > { %v6697_v49 = vpop.f32.mrf.mxu1 }
 0xa9b   : > { %v5277_v19 = vpop.trf.xlu1 }
 0xa9f   : > { %v5278_v58 = vpop.trf.xlu1 }
 0xab0   : > { %v4830_v31 = vpop.f32.mrf.mxu0 }
 0xab1   : > { %5293 = vxpose.xlu0.b32.start.end [1/1] (short) (narrow) %v4830_v31, 16 }
 0xab2   : > { %v6690_v8 = vpop.f32.mrf.mxu0 }
 0xac3   : > { %v5341_v47 = vpop.trf.xlu1 }
 0xac4   : > { %v5501_v5 = vcombine.low %v5277_v19, %v5341_v47  ;;  %v5502_v40 = vcombine.high %v5277_v19, %v5341_v47 }
 0xac6   : > { %v5509_v56 = vrot.slane %v5501_v5, %v7347_v62  ;;  %v5516_v46 = vrot.slane %v5502_v40, %v7347_v62 }
 0xac7   : > { %v5342_v59 = vpop.trf.xlu1 }
 0xac8   : > { %v5637_v61 = vcombine.low %v5278_v58, %v5342_v59  ;;  %v5638_v13 = vcombine.high %v5278_v58, %v5342_v59 }
 0xaca   : > { %v5645_v17 = vrot.slane %v5637_v61, %v7347_v62  ;;  %v5652_v9 = vrot.slane %v5638_v13, %v7347_v62 }
 0xad3   : > { %v5067_v32 = vpop.f32.mrf.mxu1 }
 0xad4   : > { %5389 = vxpose.xlu1.b32.start.end [1/1] (short) (narrow) %v5067_v32, 16 }
 0xad5   : > { %v6711_v2 = vpop.f32.mrf.mxu1 }
 0xad7   : > { %v4988_v33 = vpop.f32.mrf.mxu0 }
 0xad8   : > { %5357 = vxpose.xlu0.b32.start.end [1/1] (short) (narrow) %v4988_v33, 16 }
 0xad9   : > { %v6704_v34 = vpop.f32.mrf.mxu0 }
 0xadb   : > { %v5225_v48 = vpop.f32.mrf.mxu1 }
 0xadc   : > { %5453 = vxpose.xlu1.b32.start.end [1/1] (short) (narrow) %v5225_v48, 16 }
 0xadd   : > { %v6725_v36 = vpop.f32.mrf.mxu1 }
 0xadf   : > { %v5146_v39 = vpop.f32.mrf.mxu0 }
 0xae0   : > { %5421 = vxpose.xlu0.b32.start.end [1/1] (short) (narrow) %v5146_v39, 16 }
 0xae1   : > { %v6718_v37 = vpop.f32.mrf.mxu0 }
 0xb2d   : > { %v5309_v44 = vpop.trf.xlu0 }
 0xb2e   : > { %v5485_v15 = vcombine.low %v5245_v50, %v5309_v44  ;;  %v5486_v54 = vcombine.high %v5245_v50, %v5309_v44 }
 0xb30   : > { %v5493_v1 = vrot.slane %v5485_v15, %v7347_v62  ;;  %v5500_v60 = vrot.slane %v5486_v54, %v7347_v62 }
 0xb31   : > { %v5310_v43 = vpop.trf.xlu0 }
 0xb32   : > { %v5549_v6 = vcombine.low %v5493_v1, %v5509_v56  ;;  %v5550_v10 = vcombine.high %v5493_v1, %v5509_v56  ;;  %v5565_v12 = vcombine.low %v5500_v60, %v5516_v46  ;;  %v5566_v18 = vcombine.high %v5500_v60, %v5516_v46 }
 0xb33   : > { %v5621_v38 = vcombine.low %v5246_v28, %v5310_v43  ;;  %v5622_v16 = vcombine.high %v5246_v28, %v5310_v43 }
 0xb34   : > { %v5557_v14 = vrot.slane %v5549_v6, %v7353_v4  ;;  %v5564_v22 = vrot.slane %v5550_v10, %v7353_v4  ;;  %v5573_v20 = vrot.slane %v5565_v12, %v7353_v4  ;;  %v5580_v27 = vrot.slane %v5566_v18, %v7353_v4 }
 0xb35   : > { %v5629_v51 = vrot.slane %v5621_v38, %v7347_v62  ;;  %v5636_v26 = vrot.slane %v5622_v16, %v7347_v62 }
 0xb36   : > { %v6392_v52 = vcombine.low %v5557_v14, %v5564_v22  ;;  %v6394_v57 = vcombine.high %v5557_v14, %v5564_v22  ;;  %v6396_v41 = vcombine.low %v5573_v20, %v5580_v27  ;;  %v6398_v35 = vcombine.high %v5573_v20, %v5580_v27 }
 0xb37   : > { %v5685_v42 = vcombine.low %v5629_v51, %v5645_v17  ;;  %v5686_v45 = vcombine.high %v5629_v51, %v5645_v17  ;;  %v5701_v53 = vcombine.low %v5636_v26, %v5652_v9  ;;  %v5702_v63 = vcombine.high %v5636_v26, %v5652_v9 }
 0xb38   : > { %v5765_v55 = vrot.slane %v6392_v52, %v7347_v62  ;;  %v5781_v24 = vrot.slane %v6394_v57, %v7347_v62  ;;  %v5797_v21 = vrot.slane %v6396_v41, %v7347_v62  ;;  %v5813_v25 = vrot.slane %v6398_v35, %v7347_v62 }
 0xb39   : > { %v5693_v0 = vrot.slane %v5685_v42, %v7353_v4  ;;  %v5700_v3 = vrot.slane %v5686_v45, %v7353_v4  ;;  %v5709_v29 = vrot.slane %v5701_v53, %v7353_v4  ;;  %v5716_v7 = vrot.slane %v5702_v63, %v7353_v4 }
 0xb3a   : > { %v5822_v11 = vcombine.high %v5765_v55, %v5781_v24  ;;  %v5854_v23 = vcombine.high %v5797_v21, %v5813_v25  ;;  %v5821_v30 = vcombine.low %v5765_v55, %v5781_v24  ;;  %v5853_v49 = vcombine.low %v5797_v21, %v5813_v25 }
 0xb3b   : > { %v6400_v31 = vcombine.low %v5693_v0, %v5700_v3  ;;  %v6402_v8 = vcombine.high %v5693_v0, %v5700_v3  ;;  %v6404_v32 = vcombine.low %v5709_v29, %v5716_v7  ;;  %v6406_v2 = vcombine.high %v5709_v29, %v5716_v7 }
 0xb3c   : > { %v5836_v33 = vrot.slane %v5822_v11, %v7353_v4  ;;  %v5868_v34 = vrot.slane %v5854_v23, %v7353_v4  ;;  %v7704_v48 = vrot.slane %v5821_v30, %v7353_v4  ;;  %v7707_v36 = vrot.slane %v5853_v49, %v7353_v4 }
 0xb3d   : > { %v5901_v39 = vrot.slane %v6400_v31, %v7347_v62  ;;  %v5917_v37 = vrot.slane %v6402_v8, %v7347_v62  ;;  %v5933_v19 = vrot.slane %v6404_v32, %v7347_v62  ;;  %v5949_v58 = vrot.slane %v6406_v2, %v7347_v62 }
 0xb3e   : > { %v5887_v50 = vcombine.low %v5836_v33, %v5868_v34  ;;  %v5886_v47 = vcombine.high %v7704_v48, %v7707_v36  ;;  %v5885_v28 = vcombine.low %v7704_v48, %v7707_v36  ;;  %v5888_v15 = vcombine.high %v5836_v33, %v5868_v34 }
 0xb3f   : > { %v5957_v5 = vcombine.low %v5901_v39, %v5917_v37  ;;  %v5989_v40 = vcombine.low %v5933_v19, %v5949_v58  ;;  %v5958_v59 = vcombine.high %v5901_v39, %v5917_v37  ;;  %v5990_v44 = vcombine.high %v5933_v19, %v5949_v58 }
 0xb40   : > { %6039 = vrot.lane.b32.xlu1 %v5887_v50, %s6883_s16  ;;  %6031 = vrot.lane.b32.xlu0 %v5886_v47, %s6882_s13 }
 0xb41   : > { %v7720_v54 = vrot.slane %v5957_v5, %v7353_v4  ;;  %v7723_v56 = vrot.slane %v5989_v40, %v7353_v4  ;;  %v5972_v46 = vrot.slane %v5958_v59, %v7353_v4  ;;  %v6004_v61 = vrot.slane %v5990_v44, %v7353_v4 }
 0xb43   : > { %v6022_v13 = vcombine.high %v7720_v54, %v7723_v56  ;;  %v6021_v1 = vcombine.low %v7720_v54, %v7723_v56  ;;  %v6023_v60 = vcombine.low %v5972_v46, %v6004_v61  ;;  %v6024_v43 = vcombine.high %v5972_v46, %v6004_v61 }
 0xb44   : > { %6047 = vrot.lane.b32.xlu0 %v5888_v15, %s6884_s19 }
 0xb45   : > { %6033 = vrot.lane.b32.xlu1 %v6022_v13, %s6882_s13 }
 0xb49   : > { %6041 = vrot.lane.b32.xlu1 %v6023_v60, %s6883_s16 }
 0xb4d   : > { %6049 = vrot.lane.b32.xlu1 %v6024_v43, %s6884_s19 }
 0xb50   : > { %v5405_v6 = vpop.trf.xlu1 }
 0xb54   : > { %v5373_v10 = vpop.trf.xlu0  ;;  %v5406_v12 = vpop.trf.xlu1 }
 0xb58   : > { %v5374_v18 = vpop.trf.xlu0  ;;  %v5469_v38 = vpop.trf.xlu1 }
 0xb59   : > { %v5533_v16 = vcombine.low %v5405_v6, %v5469_v38  ;;  %v5534_v17 = vcombine.high %v5405_v6, %v5469_v38  ;;  %v3203_v6 = vld [vmem:[%s7830_s8 + $0x18] sm:$0xff] }
 0xb5a   : > { %6726 = vmatprep.subr.mxu0 %v3203_v6 }
 0xb5b   : > { %v5541_v27 = vrot.slane %v5533_v16, %v7347_v62  ;;  %v5548_v51 = vrot.slane %v5534_v17, %v7347_v62  ;;  %6727 = vmatpush3.msra.mxu0 %v3203_v6 }
 0xb5c   : > { %v5437_v9 = vpop.trf.xlu0  ;;  %v5470_v20 = vpop.trf.xlu1 }
 0xb5d   : > { %v5517_v14 = vcombine.low %v5373_v10, %v5437_v9  ;;  %v5518_v22 = vcombine.high %v5373_v10, %v5437_v9  ;;  %v5669_v57 = vcombine.low %v5406_v12, %v5470_v20  ;;  %v5670_v41 = vcombine.high %v5406_v12, %v5470_v20  ;;  %v3202_v10 = vld [vmem:[%s7830_s8 + $0x10] sm:$0xff] }
 0xb5e   : > { %6728 = vmatprep.subr.mxu0 %v3202_v10 }
 0xb5f   : > { %v5525_v26 = vrot.slane %v5517_v14, %v7347_v62  ;;  %v5532_v52 = vrot.slane %v5518_v22, %v7347_v62  ;;  %v5677_v29 = vrot.slane %v5669_v57, %v7347_v62  ;;  %v5684_v7 = vrot.slane %v5670_v41, %v7347_v62  ;;  %6729 = vmatpush3.msra.mxu0 %v3202_v10 }
 0xb60   : > { %v5438_v35 = vpop.trf.xlu0 }
 0xb61   : > { %v5581_v42 = vcombine.low %v5525_v26, %v5541_v27  ;;  %v5582_v45 = vcombine.high %v5525_v26, %v5541_v27  ;;  %v5597_v53 = vcombine.low %v5532_v52, %v5548_v51  ;;  %v5598_v63 = vcombine.high %v5532_v52, %v5548_v51  ;;  %v3201_v27 = vld [vmem:[%s7830_s8 + $0x8] sm:$0xff]  ;;  %v3200_v51 = vld [vmem:[%s7830_s8] sm:$0xff] }
 0xb62   : > { %v5653_v55 = vcombine.low %v5374_v18, %v5438_v35  ;;  %v5654_v24 = vcombine.high %v5374_v18, %v5438_v35  ;;  %6730 = vmatprep.subr.mxu0 %v3201_v27 }
 0xb63   : > { %v5589_v21 = vrot.slane %v5581_v42, %v7353_v4  ;;  %v5596_v25 = vrot.slane %v5582_v45, %v7353_v4  ;;  %v5605_v0 = vrot.slane %v5597_v53, %v7353_v4  ;;  %v5612_v3 = vrot.slane %v5598_v63, %v7353_v4  ;;  %6731 = vmatpush3.msra.mxu0 %v3201_v27 }
 0xb64   : > { %v5661_v11 = vrot.slane %v5653_v55, %v7347_v62  ;;  %v5668_v23 = vrot.slane %v5654_v24, %v7347_v62  ;;  %6732 = vmatprep.subr.mxu0 %v3200_v51 }
 0xb65   : > { %v6393_v30 = vcombine.low %v5589_v21, %v5596_v25  ;;  %v6395_v49 = vcombine.high %v5589_v21, %v5596_v25  ;;  %v6397_v31 = vcombine.low %v5605_v0, %v5612_v3  ;;  %v6399_v8 = vcombine.high %v5605_v0, %v5612_v3  ;;  %6733 = vmatpush3.msra.mxu0 %v3200_v51 }
 0xb66   : > { %v5717_v32 = vcombine.low %v5661_v11, %v5677_v29  ;;  %v5718_v2 = vcombine.high %v5661_v11, %v5677_v29  ;;  %v5733_v33 = vcombine.low %v5668_v23, %v5684_v7  ;;  %v5734_v34 = vcombine.high %v5668_v23, %v5684_v7 }
 0xb67   : > { %v5772_v39 = vrot.slane %v6393_v30, %v7347_v62  ;;  %v5788_v37 = vrot.slane %v6395_v49, %v7347_v62  ;;  %v5804_v19 = vrot.slane %v6397_v31, %v7347_v62  ;;  %v5820_v58 = vrot.slane %v6399_v8, %v7347_v62 }
 0xb68   : > { %v5725_v50 = vrot.slane %v5717_v32, %v7353_v4  ;;  %v5732_v47 = vrot.slane %v5718_v2, %v7353_v4  ;;  %v5741_v5 = vrot.slane %v5733_v33, %v7353_v4  ;;  %v5748_v40 = vrot.slane %v5734_v34, %v7353_v4 }
 0xb69   : > { %v5837_v59 = vcombine.low %v5772_v39, %v5788_v37  ;;  %v5869_v44 = vcombine.low %v5804_v19, %v5820_v58  ;;  %v5838_v9 = vcombine.high %v5772_v39, %v5788_v37  ;;  %v5870_v14 = vcombine.high %v5804_v19, %v5820_v58 }
 0xb6a   : > { %v6401_v15 = vcombine.low %v5725_v50, %v5732_v47  ;;  %v6403_v46 = vcombine.high %v5725_v50, %v5732_v47  ;;  %v6405_v61 = vcombine.low %v5741_v5, %v5748_v40  ;;  %v6407_v13 = vcombine.high %v5741_v5, %v5748_v40 }
 0xb6b   : > { %v5845_v60 = vrot.slane %v5837_v59, %v7353_v4  ;;  %v5877_v43 = vrot.slane %v5869_v44, %v7353_v4  ;;  %v5852_v57 = vrot.slane %v5838_v9, %v7353_v4  ;;  %v5884_v41 = vrot.slane %v5870_v14, %v7353_v4  ;;  %v6408_v59 = vld [vmem:[%s7831_s9] ss:$0 sm:$0xff] }
 0xb6c   : > { %v5908_v12 = vrot.slane %v6401_v15, %v7347_v62  ;;  %v5924_v18 = vrot.slane %v6403_v46, %v7347_v62  ;;  %v5940_v38 = vrot.slane %v6405_v61, %v7347_v62  ;;  %v5956_v16 = vrot.slane %v6407_v13, %v7347_v62 }
 0xb6d   : > { %v5889_v17 = vcombine.low %v5845_v60, %v5877_v43  ;;  %v5890_v52 = vcombine.high %v5845_v60, %v5877_v43  ;;  %v5891_v53 = vcombine.low %v5852_v57, %v5884_v41  ;;  %v5892_v21 = vcombine.high %v5852_v57, %v5884_v41 }
 0xb6e   : > { %v5973_v22 = vcombine.low %v5908_v12, %v5924_v18  ;;  %v6005_v20 = vcombine.low %v5940_v38, %v5956_v16  ;;  %v5974_v42 = vcombine.high %v5908_v12, %v5924_v18  ;;  %v6006_v45 = vcombine.high %v5940_v38, %v5956_v16 }
 0xb6f   : > { %6055 = vrot.lane.b32.xlu0 %v5889_v17, %s6886_s21 }
 0xb70   : > { %v5981_v62 = vrot.slane %v5973_v22, %v7353_v4  ;;  %v6013_v26 = vrot.slane %v6005_v20, %v7353_v4  ;;  %v5988_v55 = vrot.slane %v5974_v42, %v7353_v4  ;;  %v6020_v24 = vrot.slane %v6006_v45, %v7353_v4 }
 0xb72   : > { %v6025_v35 = vcombine.low %v5981_v62, %v6013_v26  ;;  %v6026_v63 = vcombine.high %v5981_v62, %v6013_v26  ;;  %v6027_v25 = vcombine.low %v5988_v55, %v6020_v24  ;;  %v6028_v0 = vcombine.high %v5988_v55, %v6020_v24 }
 0xb73   : > { %6063 = vrot.lane.b32.xlu0 %v5890_v52, %s6885_s20 }
 0xb74   : > { %6057 = vrot.lane.b32.xlu1 %v6025_v35, %s6886_s21 }
 0xb77   : > { %6071 = vrot.lane.b32.xlu0 %v5891_v53, %s6888_s24 }
 0xb78   : > { %6065 = vrot.lane.b32.xlu1 %v6026_v63, %s6885_s20 }
 0xb7b   : > { %6079 = vrot.lane.b32.xlu0 %v5892_v21, %s6887_s22 }
 0xb7c   : > { %6073 = vrot.lane.b32.xlu1 %v6027_v25, %s6888_s24 }
 0xb80   : > { %6081 = vrot.lane.b32.xlu1 %v6028_v0, %s6887_s22 }
 0xbb2   : > { %v6040_v3 = vpop.permute.xlu1 %6039  ;;  %v6032_v7 = vpop.permute.xlu0 %6031 }
 0xbb3   : > { %v6085_v31 = vsel %vm949_vm3, %v5885_v28, %v6032_v7 }
 0xbb4   : > { %v6087_v32 = vsel %vm3109_vm5, %v6085_v31, %v6040_v3 }
 0xbb6   : > { %v6048_v23 = vpop.permute.xlu0 %6047 }
 0xbb7   : > { %v6034_v29 = vpop.permute.xlu1 %6033  ;;  %v6089_v33 = vsel %vm3111_vm6, %v6087_v32, %v6048_v23 }
 0xbb8   : > { %v6086_v19 = vsel %vm949_vm3, %v6021_v1, %v6034_v29 }
 0xbbb   : > { %v6042_v11 = vpop.permute.xlu1 %6041 }
 0xbbc   : > { %v6088_v28 = vsel %vm3109_vm5, %v6086_v19, %v6042_v11 }
 0xbbf   : > { %v6050_v4 = vpop.permute.xlu1 %6049 }
 0xbc0   : > { %v6090_v47 = vsel %vm3111_vm6, %v6088_v28, %v6050_v4 }
 0xbe1   : > { %v6056_v30 = vpop.permute.xlu0 %6055 }
 0xbe2   : > { %v6091_v39 = vsel %vm1551_vm4, %v6089_v33, %v6056_v30 }
 0xbe5   : > { %v6064_v49 = vpop.permute.xlu0 %6063 }
 0xbe6   : > { %v6058_v8 = vpop.permute.xlu1 %6057  ;;  %v6093_v37 = vsel %vm3114_vm7, %v6091_v39, %v6064_v49 }
 0xbe7   : > { %v6092_v5 = vsel %vm1551_vm4, %v6090_v47, %v6058_v8 }
 0xbe9   : > { %v6072_v2 = vpop.permute.xlu0 %6071 }
 0xbea   : > { %v6066_v34 = vpop.permute.xlu1 %6065  ;;  %v6095_v48 = vsel %vm3116_vm8, %v6093_v37, %v6072_v2 }
 0xbeb   : > { %v6094_v40 = vsel %vm3114_vm7, %v6092_v5, %v6066_v34 }
 0xbed   : > { %v6080_v36 = vpop.permute.xlu0 %6079 }
 0xbee   : > { %v6097_v58 = vsel %vm3118_vm9, %v6095_v48, %v6080_v36  ;;  %v6074_v50 = vpop.permute.xlu1 %6073 }
 0xbef   : > { %6734 = vmatprep.mubr.msk.f32.mxu0 %vm429_vm0, %v6097_v58  ;;  %v6096_v54 = vsel %vm3116_vm8, %v6094_v40, %v6074_v50 }
 0xbf2   : > { %v6082_v56 = vpop.permute.xlu1 %6081 }
 0xbf3   : > { %v6098_v1 = vsel %vm3118_vm9, %v6096_v54, %v6082_v56 }
 0xbf4   : > { %6735 = vmatmul.mubr.msk.f32.vlgmr.msra.gmra.mxu0 %vm429_vm0, %v6098_v1 }
 0xcb4   : > { %v6736_v44 = vpop.f32.mrf.mxu0 }
 0xcb5   : > { %v6183_v15 = vadd.f32 %v6736_v44, %v6408_v59 }
 0xcb6   : > { %v6177_v46 = vpop.f32.mrf.mxu0 }
 0xcb7   : > { %6187 = vst.msk [vmem:[%s414_s26 + $0x8] sm:$0xff] %vm429_vm0, %v6183_v15  ;;  %v6178_v61 = vadd.f32 %v6408_v59, %v6177_v46 }
 0xcb9   : > { %6186 = vst.msk [vmem:[%s414_s26] sm:$0xff] %vm429_vm0, %v6178_v61 }
 0xcba PF: > { %s22_s17 = sadd.s32 1, %s6867_s17  }
 0xcbb   : > { %p19_p4 = scmp.ge.s32.totalorder %s22_s17, 4  }
 0xcbd   :  { %21 = sbr.rel (!%p19_p4) target bundleno = 1 (0x1), region = 105 }

</bundles_post_ra>
